<compile_context>
chip_gen: v7x
topology: tpu7x:2x2x1
jax: 0.10.0
libtpu: 0.0.40
codegen_flags: <defaults>
</compile_context>

<pallas_src>
import functools
import math

import jax
import jax.numpy as jnp
from jax.experimental import pallas as pl
from jax.experimental.pallas import tpu as pltpu


def _layer_norm(x, gamma, beta, eps=1e-6):
    mu = jnp.mean(x, axis=-1, keepdims=True)
    xc = x - mu
    var = jnp.mean(xc * xc, axis=-1, keepdims=True)
    return xc * jax.lax.rsqrt(var + eps) * gamma + beta


def byte_encoder_layer_kernel(
    x_ref,
    wqkv_ref, wo_ref,
    ln1_g_ref, ln1_b_ref,
    w1_ref, b1_ref, w2_ref, b2_ref,
    ln2_g_ref, ln2_b_ref,
    *out_refs,
    num_heads, d_k, d_v,
):
    if len(out_refs) == 2:
        score_ref, out_ref = out_refs
    else:
        score_ref = None
        (out_ref,) = out_refs

    tb, seq, d_model = x_ref.shape
    h_dk = num_heads * d_k

    x = x_ref[...]                                     # (TB, S, D) fp32
    x2 = x.reshape(tb * seq, d_model)                  # residual path stays fp32
    x2_bf = x2.astype(jnp.bfloat16)

    # ---- fused Q/K/V projection: one bf16 MXU matmul, fp32 accumulation ----
    qkv = jnp.dot(x2_bf, wqkv_ref[...], preferred_element_type=jnp.float32)

    inv_sqrt_dk = 1.0 / math.sqrt(d_k)

    p_list = []
    attn_out = None
    for h in range(num_heads):                         # small static unroll
        q_h = qkv[:, h * d_k:(h + 1) * d_k].reshape(tb, seq, d_k)
        k_h = qkv[:, h_dk + h * d_k:h_dk + (h + 1) * d_k].reshape(tb, seq, d_k)
        v_h = qkv[:, 2 * h_dk + h * d_v:2 * h_dk + (h + 1) * d_v].reshape(tb, seq, d_v)

        # scaled dot-product scores (bf16 matmul, fp32 accumulate)
        s = jnp.einsum("bqd,bkd->bqk",
                       q_h.astype(jnp.bfloat16), k_h.astype(jnp.bfloat16),
                       preferred_element_type=jnp.float32) * inv_sqrt_dk

        # numerically stable softmax over the key axis, fp32 math, EUP reciprocal
        m = jnp.max(s, axis=-1, keepdims=True)
        e = jnp.exp(s - m)
        p = e * pl.reciprocal(jnp.sum(e, axis=-1, keepdims=True), approx=True)

        if score_ref is not None:
            p_list.append(p.reshape(tb, 1, seq, seq))

        ctx_h = jnp.einsum("bqk,bkd->bqd",
                           p.astype(jnp.bfloat16), v_h.astype(jnp.bfloat16),
                           preferred_element_type=jnp.float32)     # (TB, S, dv)

        # output projection per head, accumulated in fp32 — no lane-axis concat
        contrib = jnp.dot(ctx_h.reshape(tb * seq, d_v).astype(jnp.bfloat16),
                          wo_ref[h], preferred_element_type=jnp.float32)
        attn_out = contrib if attn_out is None else attn_out + contrib

    if score_ref is not None:
        # single lane-dense slab store of all heads (no per-head strided writes)
        score_ref[...] = jnp.concatenate(p_list, axis=1)

    # TODO(synk): nn.Dropout(p=0.1) treated as identity (inference mode); mask=None.
    y = _layer_norm(attn_out + x2, ln1_g_ref[...], ln1_b_ref[...])     # (TB*S, D)

    # ---- position-wise feed-forward + residual + LayerNorm ----
    ff = jnp.maximum(
        jnp.dot(y.astype(jnp.bfloat16), w1_ref[...],
                preferred_element_type=jnp.float32) + b1_ref[...], 0.0)
    ff2 = jnp.dot(ff.astype(jnp.bfloat16), w2_ref[...],
                  preferred_element_type=jnp.float32) + b2_ref[...]
    z = _layer_norm(ff2 + y, ln2_g_ref[...], ln2_b_ref[...])

    out_ref[...] = z.reshape(tb, seq, d_model)


def _tpu_vmem_and_cores():
    """Per-TensorCore VMEM capacity and TensorCore count (conservative fallbacks)."""
    vmem_cap = 64 << 20          # v7x has the smallest per-TC VMEM
    num_cores = 1
    try:
        info = pltpu.get_tpu_info()
        vmem_cap = int(getattr(info, "vmem_capacity_bytes", vmem_cap))
    except Exception:
        pass
    try:
        num_cores = int(getattr(jax.devices()[0], "num_cores", 1))
    except Exception:
        pass
    return vmem_cap, max(1, num_cores)


def _pick_batch_tile(batch, seq, d_model, d_hid, num_heads, d_k, d_v, write_scores):
    """Largest batch tile fitting the generation's VMEM budget; keep >= one grid
    step per TensorCore only when the chip actually has more than one."""
    vmem_cap, num_cores = _tpu_vmem_and_cores()
    vmem_limit = int(min(vmem_cap * 3 // 4, 100 << 20))

    qkv_cols = num_heads * (2 * d_k + d_v)
    # bf16 weights, double-buffered by the pipeline (constant index_map)
    weight_bytes = 2 * 2 * (d_model * qkv_cols + num_heads * d_v * d_model
                            + 2 * d_model * d_hid)
    # per-batch-element footprint: fp32 intermediates + bf16 matmul copies +
    # double-buffered input/output blocks
    per_elem = (
        seq * d_model * (2 * 4 * 2)                 # x in + out blocks (fp32, x2 bufs)
        + seq * d_model * (2 + 3 * 4)               # x bf16; attn_out / y / z fp32
        + seq * qkv_cols * (4 + 2)                  # fused qkv fp32 + bf16 head views
        + num_heads * seq * seq * (3 * 4 + 2)       # s / e / p fp32 + p bf16
        + seq * num_heads * d_v * (4 + 2)           # ctx
        + seq * d_hid * (4 + 2)                     # ffn hidden fp32 + bf16
    )
    if write_scores:
        per_elem += num_heads * seq * seq * 4 * 2   # score output block, x2 bufs

    budget = max(vmem_limit - weight_bytes - (2 << 20), per_elem)
    tb = max(1, min(batch, budget // per_elem))
    if num_cores > 1 and batch >= num_cores:
        tb = min(tb, max(1, batch // num_cores))    # feed every TensorCore
    while batch % tb != 0:
        tb -= 1
    return int(tb), vmem_limit


def byte_encoder_layer(x, p, *, num_heads, d_k, d_v, write_scores=True):
    """x: (B, S, D) fp32. p: dict of layer params (JAX (in, out) weight convention).
    Returns (score or None, out)."""
    batch, seq, d_model = x.shape
    d_hid = p["w1"].shape[1]
    tb, vmem_limit = _pick_batch_tile(batch, seq, d_model, d_hid,
                                      num_heads, d_k, d_v, write_scores)

    # bf16 weights for the MXU; fused QKV; WO pre-reshaped to (H, d_v, D)
    wqkv = jnp.concatenate([p["wq"], p["wk"], p["wv"]], axis=1).astype(jnp.bfloat16)
    wo3 = p["wo"].reshape(num_heads, d_v, d_model).astype(jnp.bfloat16)
    w1 = p["w1"].astype(jnp.bfloat16)
    w2 = p["w2"].astype(jnp.bfloat16)

    kernel = functools.partial(byte_encoder_layer_kernel,
                               num_heads=num_heads, d_k=d_k, d_v=d_v)

    def full_spec(a):
        nd = a.ndim
        return pl.BlockSpec(a.shape, lambda i, _nd=nd: (0,) * _nd)

    in_specs = [
        pl.BlockSpec((tb, seq, d_model), lambda i: (i, 0, 0)),       # x tile
        full_spec(wqkv), full_spec(wo3),
        full_spec(p["ln1_g"]), full_spec(p["ln1_b"]),
        full_spec(w1), full_spec(p["b1"]),
        full_spec(w2), full_spec(p["b2"]),
        full_spec(p["ln2_g"]), full_spec(p["ln2_b"]),
    ]

    if write_scores:
        out_shape = (
            jax.ShapeDtypeStruct((batch, num_heads, seq, seq), jnp.float32),
            jax.ShapeDtypeStruct((batch, seq, d_model), jnp.float32),
        )
        out_specs = (
            pl.BlockSpec((tb, num_heads, seq, seq), lambda i: (i, 0, 0, 0)),
            pl.BlockSpec((tb, seq, d_model), lambda i: (i, 0, 0)),
        )
    else:
        out_shape = jax.ShapeDtypeStruct((batch, seq, d_model), jnp.float32)
        out_specs = pl.BlockSpec((tb, seq, d_model), lambda i: (i, 0, 0))

    result = pl.pallas_call(
        kernel,
        out_shape=out_shape,
        grid_spec=pltpu.PrefetchScalarGridSpec(
            num_scalar_prefetch=0,
            grid=(batch // tb,),
            in_specs=in_specs,
            out_specs=out_specs,
        ),
        compiler_params=pltpu.CompilerParams(
            dimension_semantics=("parallel",),
            vmem_limit_bytes=vmem_limit,
        ),
    )(x, wqkv, wo3, p["ln1_g"], p["ln1_b"], w1, p["b1"], w2, p["b2"],
      p["ln2_g"], p["ln2_b"])

    if write_scores:
        score, out = result
        return score, out
    return None, result


def byte_encoder(x, params_list, *, num_heads, d_k, d_v):
    """Matches ByteEncoder.forward: runs each layer; only the last layer's score
    is ever returned, so intermediate layers skip the (B,H,S,S) HBM write."""
    out = x
    score = None
    n = len(params_list)
    for li, p in enumerate(params_list):
        score, out = byte_encoder_layer(out, p, num_heads=num_heads, d_k=d_k,
                                        d_v=d_v, write_scores=(li == n - 1))
    return score, out


# ----------------------------- pure-JAX reference -----------------------------

def _layer_norm_ref(x, g, b, eps=1e-6):
    mu = jnp.mean(x, axis=-1, keepdims=True)
    var = jnp.mean((x - mu) ** 2, axis=-1, keepdims=True)
    return (x - mu) / jnp.sqrt(var + eps) * g + b


def byte_encoder_ref(x, params_list, num_heads, d_k, d_v):
    out = x
    score = None
    for p in params_list:
        B, S, D = out.shape
        residual = out
        q = (out @ p["wq"]).reshape(B, S, num_heads, d_k).transpose(0, 2, 1, 3)
        k = (out @ p["wk"]).reshape(B, S, num_heads, d_k).transpose(0, 2, 1, 3)
        v = (out @ p["wv"]).reshape(B, S, num_heads, d_v).transpose(0, 2, 1, 3)
        s = jnp.einsum("bhqd,bhkd->bhqk", q, k) / math.sqrt(d_k)
        score = jax.nn.softmax(s, axis=-1)
        ctx = jnp.einsum("bhqk,bhkd->bhqd", score, v)
        ctx = ctx.transpose(0, 2, 1, 3).reshape(B, S, num_heads * d_v)
        y = _layer_norm_ref(ctx @ p["wo"] + residual, p["ln1_g"], p["ln1_b"])
        ff = jax.nn.relu(y @ p["w1"] + p["b1"])
        out = _layer_norm_ref(ff @ p["w2"] + p["b2"] + y, p["ln2_g"], p["ln2_b"])
    return score, out


def init_layer_params(key, d_model, num_heads, d_k, d_v, d_hid):
    ks = jax.random.split(key, 12)

    def lin(k, fan_in, shape):
        bound = 1.0 / math.sqrt(fan_in)
        return jax.random.uniform(k, shape, minval=-bound, maxval=bound,
                                  dtype=jnp.float32)

    return dict(
        wq=lin(ks[0], d_model, (d_model, num_heads * d_k)),
        wk=lin(ks[1], d_model, (d_model, num_heads * d_k)),
        wv=lin(ks[2], d_model, (d_model, num_heads * d_v)),
        wo=lin(ks[3], num_heads * d_v, (num_heads * d_v, d_model)),
        ln1_g=1.0 + 0.1 * jax.random.normal(ks[4], (1, d_model), dtype=jnp.float32),
        ln1_b=0.1 * jax.random.normal(ks[5], (1, d_model), dtype=jnp.float32),
        w1=lin(ks[6], d_model, (d_model, d_hid)),
        b1=lin(ks[7], d_model, (1, d_hid)),
        w2=lin(ks[8], d_hid, (d_hid, d_model)),
        b2=lin(ks[9], d_hid, (1, d_model)),
        ln2_g=1.0 + 0.1 * jax.random.normal(ks[10], (1, d_model), dtype=jnp.float32),
        ln2_b=0.1 * jax.random.normal(ks[11], (1, d_model), dtype=jnp.float32),
    )


if __name__ == "__main__":
    num_layers = 2
    B, S = 4, 8
    d_model, num_heads, d_k, d_v, d_hid = 32, 4, 8, 8, 64

    key = jax.random.PRNGKey(0)
    kx, kp = jax.random.split(key)
    x = jax.random.normal(kx, (B, S, d_model), dtype=jnp.float32)
    layer_keys = jax.random.split(kp, num_layers)
    params_list = [init_layer_params(k, d_model, num_heads, d_k, d_v, d_hid)
                   for k in layer_keys]

    score, out = byte_encoder(x, params_list, num_heads=num_heads, d_k=d_k, d_v=d_v)
    jax.block_until_ready((score, out))

    score_ref, out_ref = byte_encoder_ref(x, params_list, num_heads, d_k, d_v)
    assert score.shape == (B, num_heads, S, S) and out.shape == (B, S, d_model)
    # bf16 matmuls + approx reciprocal => slightly looser tolerances than pure fp32
    assert jnp.allclose(score, score_ref, atol=2e-2, rtol=2e-2)
    assert jnp.allclose(out, out_ref, atol=5e-2, rtol=5e-2)

    print("KERNEL_OK")
</pallas_src>

<mosaic_0001>
module attributes {stable_mosaic.version = 11 : i64} {
  func.func @byte_encoder_layer_kernel(%arg0: i32, %arg1: memref<4x8x32xf32, #tpu.memory_space<vmem>>, %arg2: memref<32x96xbf16, #tpu.memory_space<vmem>>, %arg3: memref<4x8x32xbf16, #tpu.memory_space<vmem>>, %arg4: memref<1x32xf32, #tpu.memory_space<vmem>>, %arg5: memref<1x32xf32, #tpu.memory_space<vmem>>, %arg6: memref<32x64xbf16, #tpu.memory_space<vmem>>, %arg7: memref<1x64xf32, #tpu.memory_space<vmem>>, %arg8: memref<64x32xbf16, #tpu.memory_space<vmem>>, %arg9: memref<1x32xf32, #tpu.memory_space<vmem>>, %arg10: memref<1x32xf32, #tpu.memory_space<vmem>>, %arg11: memref<1x32xf32, #tpu.memory_space<vmem>>, %arg12: memref<4x8x32xf32, #tpu.memory_space<vmem>>) attributes {dimension_semantics = [#tpu.dimension_semantics<parallel>], iteration_bounds = array<i64: 1>, scalar_prefetch = 0 : i64, scratch_operands = 0 : i64, tpu.core_type = #tpu.core_type<tc>, window_params = [{transform_indices = @transform_0, window_bounds = array<i64: 4, 8, 32>}, {pipeline_mode = #tpu.pipeline_mode<synchronous>, transform_indices = @transform_1, window_bounds = array<i64: 32, 96>}, {pipeline_mode = #tpu.pipeline_mode<synchronous>, transform_indices = @transform_2, window_bounds = array<i64: 4, 8, 32>}, {pipeline_mode = #tpu.pipeline_mode<synchronous>, transform_indices = @transform_3, window_bounds = array<i64: 1, 32>}, {pipeline_mode = #tpu.pipeline_mode<synchronous>, transform_indices = @transform_4, window_bounds = array<i64: 1, 32>}, {pipeline_mode = #tpu.pipeline_mode<synchronous>, transform_indices = @transform_5, window_bounds = array<i64: 32, 64>}, {pipeline_mode = #tpu.pipeline_mode<synchronous>, transform_indices = @transform_6, window_bounds = array<i64: 1, 64>}, {pipeline_mode = #tpu.pipeline_mode<synchronous>, transform_indices = @transform_7, window_bounds = array<i64: 64, 32>}, {pipeline_mode = #tpu.pipeline_mode<synchronous>, transform_indices = @transform_8, window_bounds = array<i64: 1, 32>}, {pipeline_mode = #tpu.pipeline_mode<synchronous>, transform_indices = @transform_9, window_bounds = array<i64: 1, 32>}, {pipeline_mode = #tpu.pipeline_mode<synchronous>, transform_indices = @transform_10, window_bounds = array<i64: 1, 32>}, {transform_indices = @transform_11, window_bounds = array<i64: 4, 8, 32>}]} {
    %c0 = arith.constant 0 : index
    %c0_0 = arith.constant 0 : index
    %c0_1 = arith.constant 0 : index
    %0 = vector.load %arg1[%c0, %c0_0, %c0_1] : memref<4x8x32xf32, #tpu.memory_space<vmem>>, vector<4x8x32xf32>
    %1 = vector.shape_cast %0 : vector<4x8x32xf32> to vector<32x32xf32>
    %2 = arith.truncf %1 : vector<32x32xf32> to vector<32x32xbf16>
    %c0_2 = arith.constant 0 : index
    %c0_3 = arith.constant 0 : index
    %3 = vector.load %arg2[%c0_2, %c0_3] : memref<32x96xbf16, #tpu.memory_space<vmem>>, vector<32x96xbf16>
    %cst = arith.constant dense<0.000000e+00> : vector<32x96xf32>
    %4 = tpu.matmul %2, %3, %cst {dimension_numbers = #tpu.dot_dimension_numbers<[1], [0], [0], [1], [0, 0, 1, 1], [], []>} : vector<32x32xbf16>, vector<32x96xbf16>, vector<32x96xf32> -> vector<32x96xf32>
    %5 = vector.extract_strided_slice %4 {offsets = [0, 0], sizes = [32, 8], strides = [1, 1]} : vector<32x96xf32> to vector<32x8xf32>
    %6 = vector.shape_cast %5 : vector<32x8xf32> to vector<4x8x8xf32>
    %7 = vector.extract_strided_slice %4 {offsets = [0, 32], sizes = [32, 8], strides = [1, 1]} : vector<32x96xf32> to vector<32x8xf32>
    %8 = vector.shape_cast %7 : vector<32x8xf32> to vector<4x8x8xf32>
    %9 = vector.extract_strided_slice %4 {offsets = [0, 64], sizes = [32, 8], strides = [1, 1]} : vector<32x96xf32> to vector<32x8xf32>
    %10 = vector.shape_cast %9 : vector<32x8xf32> to vector<4x8x8xf32>
    %11 = arith.truncf %6 : vector<4x8x8xf32> to vector<4x8x8xbf16>
    %12 = arith.truncf %8 : vector<4x8x8xf32> to vector<4x8x8xbf16>
    "tpu.trace_start"() <{level = 10 : i32, message = "bqd,bkd->bqk"}> : () -> ()
    %cst_4 = arith.constant dense<0.000000e+00> : vector<4x8x8xf32>
    %13 = tpu.matmul %11, %12, %cst_4 {dimension_numbers = #tpu.dot_dimension_numbers<[2], [2], [1], [1], [0, 0, 0, 1, 1, 1], [0], [0]>} : vector<4x8x8xbf16>, vector<4x8x8xbf16>, vector<4x8x8xf32> -> vector<4x8x8xf32>
    "tpu.trace_stop"() : () -> ()
    %cst_5 = arith.constant 0.353553385 : f32
    %14 = vector.broadcast %cst_5 : f32 to vector<4x8x8xf32>
    %15 = arith.mulf %13, %14 : vector<4x8x8xf32>
    %cst_6 = arith.constant dense<0xFF800000> : vector<4x8xf32>
    %16 = vector.multi_reduction <maximumf>, %15, %cst_6 [2] : vector<4x8x8xf32> to vector<4x8xf32>
    %17 = vector.shape_cast %16 : vector<4x8xf32> to vector<4x8x1xf32>
    %18 = vector.broadcast %17 : vector<4x8x1xf32> to vector<4x8x8xf32>
    %19 = arith.subf %15, %18 : vector<4x8x8xf32>
    %20 = math.exp %19 : vector<4x8x8xf32>
    %cst_7 = arith.constant dense<0.000000e+00> : vector<4x8xf32>
    %21 = vector.multi_reduction <add>, %20, %cst_7 [2] : vector<4x8x8xf32> to vector<4x8xf32>
    %22 = vector.shape_cast %21 : vector<4x8xf32> to vector<4x8x1xf32>
    %23 = tpu.reciprocal %22 {approx = true} : vector<4x8x1xf32> -> vector<4x8x1xf32>
    %24 = vector.broadcast %23 : vector<4x8x1xf32> to vector<4x8x8xf32>
    %25 = arith.mulf %20, %24 : vector<4x8x8xf32>
    %26 = arith.truncf %25 : vector<4x8x8xf32> to vector<4x8x8xbf16>
    %27 = arith.truncf %10 : vector<4x8x8xf32> to vector<4x8x8xbf16>
    "tpu.trace_start"() <{level = 10 : i32, message = "bqk,bkd->bqd"}> : () -> ()
    %cst_8 = arith.constant dense<0.000000e+00> : vector<4x8x8xf32>
    %28 = tpu.matmul %26, %27, %cst_8 {dimension_numbers = #tpu.dot_dimension_numbers<[2], [1], [1], [2], [0, 0, 0, 1, 1, 2], [0], [0]>} : vector<4x8x8xbf16>, vector<4x8x8xbf16>, vector<4x8x8xf32> -> vector<4x8x8xf32>
    "tpu.trace_stop"() : () -> ()
    %29 = vector.shape_cast %28 : vector<4x8x8xf32> to vector<32x8xf32>
    %30 = arith.truncf %29 : vector<32x8xf32> to vector<32x8xbf16>
    %c0_9 = arith.constant 0 : index
    %c0_10 = arith.constant 0 : index
    %c0_11 = arith.constant 0 : index
    %31 = vector.load %arg3[%c0_9, %c0_10, %c0_11] : memref<4x8x32xbf16, #tpu.memory_space<vmem>>, vector<1x8x32xbf16>
    %32 = vector.shape_cast %31 : vector<1x8x32xbf16> to vector<8x32xbf16>
    %cst_12 = arith.constant dense<0.000000e+00> : vector<32x32xf32>
    %33 = tpu.matmul %30, %32, %cst_12 {dimension_numbers = #tpu.dot_dimension_numbers<[1], [0], [0], [1], [0, 0, 1, 1], [], []>} : vector<32x8xbf16>, vector<8x32xbf16>, vector<32x32xf32> -> vector<32x32xf32>
    %34 = vector.extract_strided_slice %4 {offsets = [0, 8], sizes = [32, 8], strides = [1, 1]} : vector<32x96xf32> to vector<32x8xf32>
    %35 = vector.shape_cast %34 : vector<32x8xf32> to vector<4x8x8xf32>
    %36 = vector.extract_strided_slice %4 {offsets = [0, 40], sizes = [32, 8], strides = [1, 1]} : vector<32x96xf32> to vector<32x8xf32>
    %37 = vector.shape_cast %36 : vector<32x8xf32> to vector<4x8x8xf32>
    %38 = vector.extract_strided_slice %4 {offsets = [0, 72], sizes = [32, 8], strides = [1, 1]} : vector<32x96xf32> to vector<32x8xf32>
    %39 = vector.shape_cast %38 : vector<32x8xf32> to vector<4x8x8xf32>
    %40 = arith.truncf %35 : vector<4x8x8xf32> to vector<4x8x8xbf16>
    %41 = arith.truncf %37 : vector<4x8x8xf32> to vector<4x8x8xbf16>
    "tpu.trace_start"() <{level = 10 : i32, message = "bqd,bkd->bqk"}> : () -> ()
    %cst_13 = arith.constant dense<0.000000e+00> : vector<4x8x8xf32>
    %42 = tpu.matmul %40, %41, %cst_13 {dimension_numbers = #tpu.dot_dimension_numbers<[2], [2], [1], [1], [0, 0, 0, 1, 1, 1], [0], [0]>} : vector<4x8x8xbf16>, vector<4x8x8xbf16>, vector<4x8x8xf32> -> vector<4x8x8xf32>
    "tpu.trace_stop"() : () -> ()
    %cst_14 = arith.constant 0.353553385 : f32
    %43 = vector.broadcast %cst_14 : f32 to vector<4x8x8xf32>
    %44 = arith.mulf %42, %43 : vector<4x8x8xf32>
    %cst_15 = arith.constant dense<0xFF800000> : vector<4x8xf32>
    %45 = vector.multi_reduction <maximumf>, %44, %cst_15 [2] : vector<4x8x8xf32> to vector<4x8xf32>
    %46 = vector.shape_cast %45 : vector<4x8xf32> to vector<4x8x1xf32>
    %47 = vector.broadcast %46 : vector<4x8x1xf32> to vector<4x8x8xf32>
    %48 = arith.subf %44, %47 : vector<4x8x8xf32>
    %49 = math.exp %48 : vector<4x8x8xf32>
    %cst_16 = arith.constant dense<0.000000e+00> : vector<4x8xf32>
    %50 = vector.multi_reduction <add>, %49, %cst_16 [2] : vector<4x8x8xf32> to vector<4x8xf32>
    %51 = vector.shape_cast %50 : vector<4x8xf32> to vector<4x8x1xf32>
    %52 = tpu.reciprocal %51 {approx = true} : vector<4x8x1xf32> -> vector<4x8x1xf32>
    %53 = vector.broadcast %52 : vector<4x8x1xf32> to vector<4x8x8xf32>
    %54 = arith.mulf %49, %53 : vector<4x8x8xf32>
    %55 = arith.truncf %54 : vector<4x8x8xf32> to vector<4x8x8xbf16>
    %56 = arith.truncf %39 : vector<4x8x8xf32> to vector<4x8x8xbf16>
    "tpu.trace_start"() <{level = 10 : i32, message = "bqk,bkd->bqd"}> : () -> ()
    %cst_17 = arith.constant dense<0.000000e+00> : vector<4x8x8xf32>
    %57 = tpu.matmul %55, %56, %cst_17 {dimension_numbers = #tpu.dot_dimension_numbers<[2], [1], [1], [2], [0, 0, 0, 1, 1, 2], [0], [0]>} : vector<4x8x8xbf16>, vector<4x8x8xbf16>, vector<4x8x8xf32> -> vector<4x8x8xf32>
    "tpu.trace_stop"() : () -> ()
    %58 = vector.shape_cast %57 : vector<4x8x8xf32> to vector<32x8xf32>
    %59 = arith.truncf %58 : vector<32x8xf32> to vector<32x8xbf16>
    %c1 = arith.constant 1 : index
    %c0_18 = arith.constant 0 : index
    %c0_19 = arith.constant 0 : index
    %60 = vector.load %arg3[%c1, %c0_18, %c0_19] : memref<4x8x32xbf16, #tpu.memory_space<vmem>>, vector<1x8x32xbf16>
    %61 = vector.shape_cast %60 : vector<1x8x32xbf16> to vector<8x32xbf16>
    %cst_20 = arith.constant dense<0.000000e+00> : vector<32x32xf32>
    %62 = tpu.matmul %59, %61, %cst_20 {dimension_numbers = #tpu.dot_dimension_numbers<[1], [0], [0], [1], [0, 0, 1, 1], [], []>} : vector<32x8xbf16>, vector<8x32xbf16>, vector<32x32xf32> -> vector<32x32xf32>
    %63 = arith.addf %33, %62 : vector<32x32xf32>
    %64 = vector.extract_strided_slice %4 {offsets = [0, 16], sizes = [32, 8], strides = [1, 1]} : vector<32x96xf32> to vector<32x8xf32>
    %65 = vector.shape_cast %64 : vector<32x8xf32> to vector<4x8x8xf32>
    %66 = vector.extract_strided_slice %4 {offsets = [0, 48], sizes = [32, 8], strides = [1, 1]} : vector<32x96xf32> to vector<32x8xf32>
    %67 = vector.shape_cast %66 : vector<32x8xf32> to vector<4x8x8xf32>
    %68 = vector.extract_strided_slice %4 {offsets = [0, 80], sizes = [32, 8], strides = [1, 1]} : vector<32x96xf32> to vector<32x8xf32>
    %69 = vector.shape_cast %68 : vector<32x8xf32> to vector<4x8x8xf32>
    %70 = arith.truncf %65 : vector<4x8x8xf32> to vector<4x8x8xbf16>
    %71 = arith.truncf %67 : vector<4x8x8xf32> to vector<4x8x8xbf16>
    "tpu.trace_start"() <{level = 10 : i32, message = "bqd,bkd->bqk"}> : () -> ()
    %cst_21 = arith.constant dense<0.000000e+00> : vector<4x8x8xf32>
    %72 = tpu.matmul %70, %71, %cst_21 {dimension_numbers = #tpu.dot_dimension_numbers<[2], [2], [1], [1], [0, 0, 0, 1, 1, 1], [0], [0]>} : vector<4x8x8xbf16>, vector<4x8x8xbf16>, vector<4x8x8xf32> -> vector<4x8x8xf32>
    "tpu.trace_stop"() : () -> ()
    %cst_22 = arith.constant 0.353553385 : f32
    %73 = vector.broadcast %cst_22 : f32 to vector<4x8x8xf32>
    %74 = arith.mulf %72, %73 : vector<4x8x8xf32>
    %cst_23 = arith.constant dense<0xFF800000> : vector<4x8xf32>
    %75 = vector.multi_reduction <maximumf>, %74, %cst_23 [2] : vector<4x8x8xf32> to vector<4x8xf32>
    %76 = vector.shape_cast %75 : vector<4x8xf32> to vector<4x8x1xf32>
    %77 = vector.broadcast %76 : vector<4x8x1xf32> to vector<4x8x8xf32>
    %78 = arith.subf %74, %77 : vector<4x8x8xf32>
    %79 = math.exp %78 : vector<4x8x8xf32>
    %cst_24 = arith.constant dense<0.000000e+00> : vector<4x8xf32>
    %80 = vector.multi_reduction <add>, %79, %cst_24 [2] : vector<4x8x8xf32> to vector<4x8xf32>
    %81 = vector.shape_cast %80 : vector<4x8xf32> to vector<4x8x1xf32>
    %82 = tpu.reciprocal %81 {approx = true} : vector<4x8x1xf32> -> vector<4x8x1xf32>
    %83 = vector.broadcast %82 : vector<4x8x1xf32> to vector<4x8x8xf32>
    %84 = arith.mulf %79, %83 : vector<4x8x8xf32>
    %85 = arith.truncf %84 : vector<4x8x8xf32> to vector<4x8x8xbf16>
    %86 = arith.truncf %69 : vector<4x8x8xf32> to vector<4x8x8xbf16>
    "tpu.trace_start"() <{level = 10 : i32, message = "bqk,bkd->bqd"}> : () -> ()
    %cst_25 = arith.constant dense<0.000000e+00> : vector<4x8x8xf32>
    %87 = tpu.matmul %85, %86, %cst_25 {dimension_numbers = #tpu.dot_dimension_numbers<[2], [1], [1], [2], [0, 0, 0, 1, 1, 2], [0], [0]>} : vector<4x8x8xbf16>, vector<4x8x8xbf16>, vector<4x8x8xf32> -> vector<4x8x8xf32>
    "tpu.trace_stop"() : () -> ()
    %88 = vector.shape_cast %87 : vector<4x8x8xf32> to vector<32x8xf32>
    %89 = arith.truncf %88 : vector<32x8xf32> to vector<32x8xbf16>
    %c2 = arith.constant 2 : index
    %c0_26 = arith.constant 0 : index
    %c0_27 = arith.constant 0 : index
    %90 = vector.load %arg3[%c2, %c0_26, %c0_27] : memref<4x8x32xbf16, #tpu.memory_space<vmem>>, vector<1x8x32xbf16>
    %91 = vector.shape_cast %90 : vector<1x8x32xbf16> to vector<8x32xbf16>
    %cst_28 = arith.constant dense<0.000000e+00> : vector<32x32xf32>
    %92 = tpu.matmul %89, %91, %cst_28 {dimension_numbers = #tpu.dot_dimension_numbers<[1], [0], [0], [1], [0, 0, 1, 1], [], []>} : vector<32x8xbf16>, vector<8x32xbf16>, vector<32x32xf32> -> vector<32x32xf32>
    %93 = arith.addf %63, %92 : vector<32x32xf32>
    %94 = vector.extract_strided_slice %4 {offsets = [0, 24], sizes = [32, 8], strides = [1, 1]} : vector<32x96xf32> to vector<32x8xf32>
    %95 = vector.shape_cast %94 : vector<32x8xf32> to vector<4x8x8xf32>
    %96 = vector.extract_strided_slice %4 {offsets = [0, 56], sizes = [32, 8], strides = [1, 1]} : vector<32x96xf32> to vector<32x8xf32>
    %97 = vector.shape_cast %96 : vector<32x8xf32> to vector<4x8x8xf32>
    %98 = vector.extract_strided_slice %4 {offsets = [0, 88], sizes = [32, 8], strides = [1, 1]} : vector<32x96xf32> to vector<32x8xf32>
    %99 = vector.shape_cast %98 : vector<32x8xf32> to vector<4x8x8xf32>
    %100 = arith.truncf %95 : vector<4x8x8xf32> to vector<4x8x8xbf16>
    %101 = arith.truncf %97 : vector<4x8x8xf32> to vector<4x8x8xbf16>
    "tpu.trace_start"() <{level = 10 : i32, message = "bqd,bkd->bqk"}> : () -> ()
    %cst_29 = arith.constant dense<0.000000e+00> : vector<4x8x8xf32>
    %102 = tpu.matmul %100, %101, %cst_29 {dimension_numbers = #tpu.dot_dimension_numbers<[2], [2], [1], [1], [0, 0, 0, 1, 1, 1], [0], [0]>} : vector<4x8x8xbf16>, vector<4x8x8xbf16>, vector<4x8x8xf32> -> vector<4x8x8xf32>
    "tpu.trace_stop"() : () -> ()
    %cst_30 = arith.constant 0.353553385 : f32
    %103 = vector.broadcast %cst_30 : f32 to vector<4x8x8xf32>
    %104 = arith.mulf %102, %103 : vector<4x8x8xf32>
    %cst_31 = arith.constant dense<0xFF800000> : vector<4x8xf32>
    %105 = vector.multi_reduction <maximumf>, %104, %cst_31 [2] : vector<4x8x8xf32> to vector<4x8xf32>
    %106 = vector.shape_cast %105 : vector<4x8xf32> to vector<4x8x1xf32>
    %107 = vector.broadcast %106 : vector<4x8x1xf32> to vector<4x8x8xf32>
    %108 = arith.subf %104, %107 : vector<4x8x8xf32>
    %109 = math.exp %108 : vector<4x8x8xf32>
    %cst_32 = arith.constant dense<0.000000e+00> : vector<4x8xf32>
    %110 = vector.multi_reduction <add>, %109, %cst_32 [2] : vector<4x8x8xf32> to vector<4x8xf32>
    %111 = vector.shape_cast %110 : vector<4x8xf32> to vector<4x8x1xf32>
    %112 = tpu.reciprocal %111 {approx = true} : vector<4x8x1xf32> -> vector<4x8x1xf32>
    %113 = vector.broadcast %112 : vector<4x8x1xf32> to vector<4x8x8xf32>
    %114 = arith.mulf %109, %113 : vector<4x8x8xf32>
    %115 = arith.truncf %114 : vector<4x8x8xf32> to vector<4x8x8xbf16>
    %116 = arith.truncf %99 : vector<4x8x8xf32> to vector<4x8x8xbf16>
    "tpu.trace_start"() <{level = 10 : i32, message = "bqk,bkd->bqd"}> : () -> ()
    %cst_33 = arith.constant dense<0.000000e+00> : vector<4x8x8xf32>
    %117 = tpu.matmul %115, %116, %cst_33 {dimension_numbers = #tpu.dot_dimension_numbers<[2], [1], [1], [2], [0, 0, 0, 1, 1, 2], [0], [0]>} : vector<4x8x8xbf16>, vector<4x8x8xbf16>, vector<4x8x8xf32> -> vector<4x8x8xf32>
    "tpu.trace_stop"() : () -> ()
    %118 = vector.shape_cast %117 : vector<4x8x8xf32> to vector<32x8xf32>
    %119 = arith.truncf %118 : vector<32x8xf32> to vector<32x8xbf16>
    %c3 = arith.constant 3 : index
    %c0_34 = arith.constant 0 : index
    %c0_35 = arith.constant 0 : index
    %120 = vector.load %arg3[%c3, %c0_34, %c0_35] : memref<4x8x32xbf16, #tpu.memory_space<vmem>>, vector<1x8x32xbf16>
    %121 = vector.shape_cast %120 : vector<1x8x32xbf16> to vector<8x32xbf16>
    %cst_36 = arith.constant dense<0.000000e+00> : vector<32x32xf32>
    %122 = tpu.matmul %119, %121, %cst_36 {dimension_numbers = #tpu.dot_dimension_numbers<[1], [0], [0], [1], [0, 0, 1, 1], [], []>} : vector<32x8xbf16>, vector<8x32xbf16>, vector<32x32xf32> -> vector<32x32xf32>
    %123 = arith.addf %93, %122 : vector<32x32xf32>
    %124 = arith.addf %123, %1 : vector<32x32xf32>
    %c0_37 = arith.constant 0 : index
    %c0_38 = arith.constant 0 : index
    %125 = vector.load %arg4[%c0_37, %c0_38] : memref<1x32xf32, #tpu.memory_space<vmem>>, vector<1x32xf32>
    %c0_39 = arith.constant 0 : index
    %c0_40 = arith.constant 0 : index
    %126 = vector.load %arg5[%c0_39, %c0_40] : memref<1x32xf32, #tpu.memory_space<vmem>>, vector<1x32xf32>
    %cst_41 = arith.constant dense<0.000000e+00> : vector<32xf32>
    %127 = vector.multi_reduction <add>, %124, %cst_41 [1] : vector<32x32xf32> to vector<32xf32>
    %128 = vector.shape_cast %127 : vector<32xf32> to vector<32x1xf32>
    %cst_42 = arith.constant 3.200000e+01 : f32
    %129 = vector.broadcast %cst_42 : f32 to vector<32x1xf32>
    %130 = arith.divf %128, %129 : vector<32x1xf32>
    %131 = vector.broadcast %130 : vector<32x1xf32> to vector<32x32xf32>
    %132 = arith.subf %124, %131 : vector<32x32xf32>
    %133 = arith.mulf %132, %132 : vector<32x32xf32>
    %cst_43 = arith.constant dense<0.000000e+00> : vector<32xf32>
    %134 = vector.multi_reduction <add>, %133, %cst_43 [1] : vector<32x32xf32> to vector<32xf32>
    %135 = vector.shape_cast %134 : vector<32xf32> to vector<32x1xf32>
    %cst_44 = arith.constant 3.200000e+01 : f32
    %136 = vector.broadcast %cst_44 : f32 to vector<32x1xf32>
    %137 = arith.divf %135, %136 : vector<32x1xf32>
    %cst_45 = arith.constant 9.99999997E-7 : f32
    %138 = vector.broadcast %cst_45 : f32 to vector<32x1xf32>
    %139 = arith.addf %137, %138 : vector<32x1xf32>
    %140 = math.rsqrt %139 : vector<32x1xf32>
    %141 = vector.broadcast %140 : vector<32x1xf32> to vector<32x32xf32>
    %142 = arith.mulf %132, %141 : vector<32x32xf32>
    %143 = vector.broadcast %125 : vector<1x32xf32> to vector<32x32xf32>
    %144 = arith.mulf %142, %143 : vector<32x32xf32>
    %145 = vector.broadcast %126 : vector<1x32xf32> to vector<32x32xf32>
    %146 = arith.addf %144, %145 : vector<32x32xf32>
    %147 = arith.truncf %146 : vector<32x32xf32> to vector<32x32xbf16>
    %c0_46 = arith.constant 0 : index
    %c0_47 = arith.constant 0 : index
    %148 = vector.load %arg6[%c0_46, %c0_47] : memref<32x64xbf16, #tpu.memory_space<vmem>>, vector<32x64xbf16>
    %cst_48 = arith.constant dense<0.000000e+00> : vector<32x64xf32>
    %149 = tpu.matmul %147, %148, %cst_48 {dimension_numbers = #tpu.dot_dimension_numbers<[1], [0], [0], [1], [0, 0, 1, 1], [], []>} : vector<32x32xbf16>, vector<32x64xbf16>, vector<32x64xf32> -> vector<32x64xf32>
    %c0_49 = arith.constant 0 : index
    %c0_50 = arith.constant 0 : index
    %150 = vector.load %arg7[%c0_49, %c0_50] : memref<1x64xf32, #tpu.memory_space<vmem>>, vector<1x64xf32>
    %151 = vector.broadcast %150 : vector<1x64xf32> to vector<32x64xf32>
    %152 = arith.addf %149, %151 : vector<32x64xf32>
    %cst_51 = arith.constant 0.000000e+00 : f32
    %153 = vector.broadcast %cst_51 : f32 to vector<32x64xf32>
    %154 = arith.maximumf %152, %153 : vector<32x64xf32>
    %155 = arith.truncf %154 : vector<32x64xf32> to vector<32x64xbf16>
    %c0_52 = arith.constant 0 : index
    %c0_53 = arith.constant 0 : index
    %156 = vector.load %arg8[%c0_52, %c0_53] : memref<64x32xbf16, #tpu.memory_space<vmem>>, vector<64x32xbf16>
    %cst_54 = arith.constant dense<0.000000e+00> : vector<32x32xf32>
    %157 = tpu.matmul %155, %156, %cst_54 {dimension_numbers = #tpu.dot_dimension_numbers<[1], [0], [0], [1], [0, 0, 1, 1], [], []>} : vector<32x64xbf16>, vector<64x32xbf16>, vector<32x32xf32> -> vector<32x32xf32>
    %c0_55 = arith.constant 0 : index
    %c0_56 = arith.constant 0 : index
    %158 = vector.load %arg9[%c0_55, %c0_56] : memref<1x32xf32, #tpu.memory_space<vmem>>, vector<1x32xf32>
    %159 = vector.broadcast %158 : vector<1x32xf32> to vector<32x32xf32>
    %160 = arith.addf %157, %159 : vector<32x32xf32>
    %161 = arith.addf %160, %146 : vector<32x32xf32>
    %c0_57 = arith.constant 0 : index
    %c0_58 = arith.constant 0 : index
    %162 = vector.load %arg10[%c0_57, %c0_58] : memref<1x32xf32, #tpu.memory_space<vmem>>, vector<1x32xf32>
    %c0_59 = arith.constant 0 : index
    %c0_60 = arith.constant 0 : index
    %163 = vector.load %arg11[%c0_59, %c0_60] : memref<1x32xf32, #tpu.memory_space<vmem>>, vector<1x32xf32>
    %cst_61 = arith.constant dense<0.000000e+00> : vector<32xf32>
    %164 = vector.multi_reduction <add>, %161, %cst_61 [1] : vector<32x32xf32> to vector<32xf32>
    %165 = vector.shape_cast %164 : vector<32xf32> to vector<32x1xf32>
    %cst_62 = arith.constant 3.200000e+01 : f32
    %166 = vector.broadcast %cst_62 : f32 to vector<32x1xf32>
    %167 = arith.divf %165, %166 : vector<32x1xf32>
    %168 = vector.broadcast %167 : vector<32x1xf32> to vector<32x32xf32>
    %169 = arith.subf %161, %168 : vector<32x32xf32>
    %170 = arith.mulf %169, %169 : vector<32x32xf32>
    %cst_63 = arith.constant dense<0.000000e+00> : vector<32xf32>
    %171 = vector.multi_reduction <add>, %170, %cst_63 [1] : vector<32x32xf32> to vector<32xf32>
    %172 = vector.shape_cast %171 : vector<32xf32> to vector<32x1xf32>
    %cst_64 = arith.constant 3.200000e+01 : f32
    %173 = vector.broadcast %cst_64 : f32 to vector<32x1xf32>
    %174 = arith.divf %172, %173 : vector<32x1xf32>
    %cst_65 = arith.constant 9.99999997E-7 : f32
    %175 = vector.broadcast %cst_65 : f32 to vector<32x1xf32>
    %176 = arith.addf %174, %175 : vector<32x1xf32>
    %177 = math.rsqrt %176 : vector<32x1xf32>
    %178 = vector.broadcast %177 : vector<32x1xf32> to vector<32x32xf32>
    %179 = arith.mulf %169, %178 : vector<32x32xf32>
    %180 = vector.broadcast %162 : vector<1x32xf32> to vector<32x32xf32>
    %181 = arith.mulf %179, %180 : vector<32x32xf32>
    %182 = vector.broadcast %163 : vector<1x32xf32> to vector<32x32xf32>
    %183 = arith.addf %181, %182 : vector<32x32xf32>
    %184 = vector.shape_cast %183 : vector<32x32xf32> to vector<4x8x32xf32>
    %c0_66 = arith.constant 0 : index
    %c0_67 = arith.constant 0 : index
    %c0_68 = arith.constant 0 : index
    %185 = vector.load %arg12[%c0_66, %c0_67, %c0_68] : memref<4x8x32xf32, #tpu.memory_space<vmem>>, vector<4x8x32xf32>
    tpu.vector_store %arg12[%c0_66, %c0_67, %c0_68], %184 {strides = array<i32>} : memref<4x8x32xf32, #tpu.memory_space<vmem>>, vector<4x8x32xf32>,
    return
  }
  func.func @transform_0(%arg0: i32) -> (i32, i32, i32) {
    %c0_i32 = arith.constant 0 : i32
    %c0_i32_0 = arith.constant 0 : i32
    %c0_i32_1 = arith.constant 0 : i32
    return %arg0, %c0_i32, %c0_i32_0 : i32, i32, i32
  }
  func.func @transform_1(%arg0: i32) -> (i32, i32) {
    %c0_i32 = arith.constant 0 : i32
    %c0_i32_0 = arith.constant 0 : i32
    %c0_i32_1 = arith.constant 0 : i32
    return %c0_i32, %c0_i32_0 : i32, i32
  }
  func.func @transform_2(%arg0: i32) -> (i32, i32, i32) {
    %c0_i32 = arith.constant 0 : i32
    %c0_i32_0 = arith.constant 0 : i32
    %c0_i32_1 = arith.constant 0 : i32
    %c0_i32_2 = arith.constant 0 : i32
    return %c0_i32, %c0_i32_0, %c0_i32_1 : i32, i32, i32
  }
  func.func @transform_3(%arg0: i32) -> (i32, i32) {
    %c0_i32 = arith.constant 0 : i32
    %c0_i32_0 = arith.constant 0 : i32
    %c0_i32_1 = arith.constant 0 : i32
    return %c0_i32, %c0_i32_0 : i32, i32
  }
  func.func @transform_4(%arg0: i32) -> (i32, i32) {
    %c0_i32 = arith.constant 0 : i32
    %c0_i32_0 = arith.constant 0 : i32
    %c0_i32_1 = arith.constant 0 : i32
    return %c0_i32, %c0_i32_0 : i32, i32
  }
  func.func @transform_5(%arg0: i32) -> (i32, i32) {
    %c0_i32 = arith.constant 0 : i32
    %c0_i32_0 = arith.constant 0 : i32
    %c0_i32_1 = arith.constant 0 : i32
    return %c0_i32, %c0_i32_0 : i32, i32
  }
  func.func @transform_6(%arg0: i32) -> (i32, i32) {
    %c0_i32 = arith.constant 0 : i32
    %c0_i32_0 = arith.constant 0 : i32
    %c0_i32_1 = arith.constant 0 : i32
    return %c0_i32, %c0_i32_0 : i32, i32
  }
  func.func @transform_7(%arg0: i32) -> (i32, i32) {
    %c0_i32 = arith.constant 0 : i32
    %c0_i32_0 = arith.constant 0 : i32
    %c0_i32_1 = arith.constant 0 : i32
    return %c0_i32, %c0_i32_0 : i32, i32
  }
  func.func @transform_8(%arg0: i32) -> (i32, i32) {
    %c0_i32 = arith.constant 0 : i32
    %c0_i32_0 = arith.constant 0 : i32
    %c0_i32_1 = arith.constant 0 : i32
    return %c0_i32, %c0_i32_0 : i32, i32
  }
  func.func @transform_9(%arg0: i32) -> (i32, i32) {
    %c0_i32 = arith.constant 0 : i32
    %c0_i32_0 = arith.constant 0 : i32
    %c0_i32_1 = arith.constant 0 : i32
    return %c0_i32, %c0_i32_0 : i32, i32
  }
  func.func @transform_10(%arg0: i32) -> (i32, i32) {
    %c0_i32 = arith.constant 0 : i32
    %c0_i32_0 = arith.constant 0 : i32
    %c0_i32_1 = arith.constant 0 : i32
    return %c0_i32, %c0_i32_0 : i32, i32
  }
  func.func @transform_11(%arg0: i32) -> (i32, i32, i32) {
    %c0_i32 = arith.constant 0 : i32
    %c0_i32_0 = arith.constant 0 : i32
    %c0_i32_1 = arith.constant 0 : i32
    return %arg0, %c0_i32, %c0_i32_0 : i32, i32, i32
  }
}

</mosaic_0001>

<bundles_post_ra>
// kernel: tpu_custom_call.1
= control target key start
LH: loop header
LB: loop body
LE: loop exit
PB: predicated region body
PF: predicated region fallthrough
CT: control target
= control target key end

     0   :  { %16 = vsyncpa [#allocation3], 0  ;;  %s3633_s0 = inlined_call_operand.vmem [shape: f32[4,8,32], index: 0, kind: input, shape index: {}]   ;;  %s3634_s1 = inlined_call_operand.vmem [shape: bf16[32,96], index: 1, kind: input, shape index: {}]   ;;  %s3635_s2 = inlined_call_operand.hbm [shape: bf16[4,8,32], index: 2, kind: input, shape index: {}]   ;;  %s3636_s3 = inlined_call_operand.vmem [shape: f32[1,32], index: 3, kind: input, shape index: {}]   ;;  %s3637_s4 = inlined_call_operand.vmem [shape: f32[1,32], index: 4, kind: input, shape index: {}]   ;;  %s3638_s5 = inlined_call_operand.hbm [shape: bf16[32,64], index: 5, kind: input, shape index: {}]   ;;  %s3639_s6 = inlined_call_operand.vmem [shape: f32[1,64], index: 6, kind: input, shape index: {}]   ;;  %s3640_s7 = inlined_call_operand.vmem [shape: bf16[64,32], index: 7, kind: input, shape index: {}]   ;;  %s3641_s8 = inlined_call_operand.vmem [shape: f32[1,32], index: 8, kind: input, shape index: {}]   ;;  %s3642_s9 = inlined_call_operand.vmem [shape: f32[1,32], index: 9, kind: input, shape index: {}]   ;;  %s3643_s10 = inlined_call_operand.vmem [shape: f32[1,32], index: 10, kind: input, shape index: {}]   ;;  %s3644_s11 = inlined_call_operand.hbm [shape: f32[4,8,32], index: 11, kind: output, shape index: {}]  }
   0x1   :  { %17 = vsyncpa [#allocation6], 0 }
   0x2   :  { %18 = vsyncpa [#allocation4], 0  ;;  %s3132_s17 = smov [#allocation2]   ;;  %s3060_s21 = scalar_lea.hbm %s3635_s2, 256 }
   0x3   :  { %s28_s18 = sshll.u32 %s3132_s17, 4  ;;  %p3061_p0 = scmp.ne.s32.totalorder %s3635_s2, %s3060_s21  ;;  %s29_s18 = int_to_ptr.vmem [resolvable:$true] %s28_s18 }
   0x4   :  { %p3064_p1 = scmp.lt.u32.totalorder %s3060_s21, %s3635_s2 }
   0x6   :  { %p3066_p2 = pnand %p3064_p1, %p3061_p0 }
   0x8   :  { %3069 = shalt.err (!%p3066_p2)
}
   0x9   :  { %s3070_s26 = scalar_lea.vmem %s29_s18, 256  ;;  %p3075_p4 = scmp.lt.s32.totalorder %s29_s18, %s29_s18 }
   0xa   :  { %p3071_p3 = scmp.ne.s32.totalorder %s29_s18, %s3070_s26  ;;  %p3076_p5 = scmp.lt.s32.totalorder %s3070_s26, %s3070_s26 }
   0xc   :  { %p3077_p6 = por %p3076_p5, %p3075_p4 }
   0xe   :  { %p3078_p7 = pnand %p3077_p6, %p3071_p3 }
  0x10   :  { %3081 = shalt.err (!%p3078_p7)
}
  0x11   :  { %s3133_s27 = smov 64   ;;  %s3134_s28 = smov 4  }
  0x12   :  { %34 = dma.hbm_to_vmem [thread:$0]  %s3635_s2, 256, %s29_s18, [#allocation3], %s3133_s27, %s3133_s27, %s3134_s28  }
  0x13   :  { %s3135_s12 = smov [#allocation5]   ;;  %s3082_s16 = scalar_lea.hbm %s3638_s5, 256 }
  0x14   :  { %s44_s13 = sshll.u32 %s3135_s12, 4  ;;  %p3083_p8 = scmp.ne.s32.totalorder %s3638_s5, %s3082_s16  ;;  %s45_s13 = int_to_ptr.vmem [resolvable:$true] %s44_s13 }
  0x15   :  { %p3086_p9 = scmp.lt.u32.totalorder %s3082_s16, %s3638_s5 }
  0x17   :  { %p3088_p10 = pnand %p3086_p9, %p3083_p8 }
  0x19   :  { %3091 = shalt.err (!%p3088_p10)
}
  0x1a   :  { %s3092_s22 = scalar_lea.vmem %s45_s13, 256  ;;  %p3097_p12 = scmp.lt.s32.totalorder %s45_s13, %s45_s13 }
  0x1b   :  { %p3093_p11 = scmp.ne.s32.totalorder %s45_s13, %s3092_s22  ;;  %p3098_p13 = scmp.lt.s32.totalorder %s3092_s22, %s3092_s22 }
  0x1d   :  { %p3099_p0 = por %p3098_p13, %p3097_p12 }
  0x1f   :  { %p3100_p1 = pnand %p3099_p0, %p3093_p11 }
  0x21   :  { %3103 = shalt.err (!%p3100_p1)
}
  0x22   :  { %50 = dma.hbm_to_vmem [thread:$0]  %s3638_s5, 256, %s45_s13, [#allocation6], %s3133_s27, %s3133_s27, %s3134_s28  }
  0x23   :  { %3126 = dma.done.wait [#allocation3], 256  }
  0x24   :  { %3127 = vsyncadd [#allocation3], 4294967040 }
  0x25   :  { %3128 = dma.done.wait [#allocation6], 256  }
  0x26   :  { %3129 = vsyncadd [#allocation6], 4294967040  ;;  %v2968_v0 = vld [vmem:[%s3634_s1] sm:$0xff]   ;;  %v2969_v1 = vld [vmem:[%s3634_s1 + $0x8] sm:$0xff]   ;;  %vm90_vm0 = vcmask 261120   ;;  %v3136_v8 = vmov 0.0  }
  0x27   :  { %2689 = vmatprep.subr.bf16.mxu1 %v2968_v0  ;;  %v68_v2 = vld [vmem:[%s3633_s0] sm:$0xff]  ;;  %v69_v3 = vld [vmem:[%s3633_s0 + $0x8] sm:$0xff]  ;;  %v70_v4 = vld [vmem:[%s3633_s0 + $0x10] sm:$0xff]  ;;  %2703 = vmatprep.subr.bf16.mxu0 %v3136_v8  ;;  %vm3137_vm1 = vmmov 0   ;;  %s3138_s1 = smov 96   ;;  %vm153_vm2 = vcmask 64512  }
  0x28   :  { %2690 = vmatpush3.bf16.msra.mxu1 %v2968_v0  ;;  %v72_v5 = vpack.c.bf16 %v69_v3, %v68_v2  ;;  %v71_v6 = vld [vmem:[%s3633_s0 + $0x18] sm:$0xff]  ;;  %2705 = vmatprep.mubr.msk.bf16.mxu0 %vm3137_vm1, %v3136_v8  ;;  %vm404_vm3 = vcmask 1043456   ;;  %s3139_s16 = smov 88   ;;  %s3140_s17 = smov 120   ;;  %vm2383_vm4 = vcmask 523264  }
  0x29   :  { %2691 = vmatprep.subr.bf16.mxu1 %v2969_v1  ;;  %v73_v7 = vpack.c.bf16 %v71_v6, %v70_v4  ;;  %s3142_s19 = smov 112   ;;  %s3143_s20 = smov 80  }
  0x2a   :  { %2693 = vmatprep.mubr.msk.bf16.mxu1 %vm90_vm0, %v72_v5  ;;  %s3144_s21 = smov 48   ;;  %s3145_s22 = smov 72  }
  0x2b   :  { %s3146_s2 = smov 104   ;;  %s3147_s18 = smov 40  }
  0x2c   :  { %2692 = vmatpush3.bf16.msra.mxu1 %v2969_v1  ;;  %s3148_s23 = smov [#allocation7]  }
  0x2d   :  { %2697 = vmatprep.subr.bf16.mxu1 %v3136_v8 }
  0x2f   :  { %2694 = vmatmul.mubr.msk.bf16.vlgmr.msra.gmra.mrb[0].mxu1 %vm90_vm0, %v73_v7 }
  0x30   :  { %2699 = vmatprep.mubr.msk.bf16.mxu1 %vm3137_vm1, %v3136_v8 }
 0x102   :  { %v2695_v9 = vpop.f32.mrb[0].mxu1 }
 0x103   :  { %v3265_v10 = vpack.c.bf16 %v2695_v9, %v2695_v9  ;;  %v131_v11 = vpop.f32.mrb[1].mxu1 }
 0x104   :  { %v3267_v12 = vpack.c.bf16 %v131_v11, %v131_v11  ;;  %v2696_v13 = vpop.f32.mrb[2].mxu1 }
 0x105   :  { %250 = vrot.lane.b32.xlu1 %v3265_v10, %s3138_s1  ;;  %v134_v14 = vpop.f32.mrb[3].mxu1  ;;  %v3271_v15 = vpack.c.bf16 %v2696_v13, %v2696_v13 }
 0x106   :  { %151 = vrot.lane.b32.xlu0 %v3267_v12, %s3138_s1  ;;  %v3273_v16 = vpack.c.bf16 %v134_v14, %v134_v14 }
 0x109   :  { %299 = vrot.lane.b32.xlu1 %v3271_v15, %s3138_s1 }
 0x10a   :  { %201 = vrot.lane.b32.xlu0 %v3273_v16, %s3138_s1 }
 0x177   :  { %v251_v19 = vpop.permute.xlu1 %250 }
 0x178   :  { %v152_v17 = vpop.permute.xlu0 %151  ;;  %v256_v22 = vsel %vm153_vm2, %v251_v19, 0 }
 0x179   :  { %v158_v18 = vsel %vm153_vm2, %v152_v17, 0 }
 0x17a   :  { %2698 = vmatpush3.bf16.xpose.msra.mxu1 %v158_v18 }
 0x17b   :  { %2709 = vmatprep.subr.bf16.mxu1 %v3136_v8  ;;  %v300_v23 = vpop.permute.xlu1 %299 }
 0x17c   :  { %v202_v20 = vpop.permute.xlu0 %201  ;;  %v305_v24 = vsel %vm153_vm2, %v300_v23, 0 }
 0x17d   :  { %v207_v21 = vsel %vm153_vm2, %v202_v20, 0 }
 0x17e   :  { %2704 = vmatpush3.bf16.xpose.msra.mxu0 %v207_v21 }
 0x17f   :  { %2715 = vmatprep.subr.bf16.mxu0 %v3136_v8 }
 0x181   :  { %2700 = vmatmul.mubr.msk.bf16.vlgmr.msra.gmra.mrb[4].mxu1 %vm153_vm2, %v3267_v12 }
 0x182   :  { %2710 = vmatpush3.bf16.xpose.msra.mxu1 %v256_v22  ;;  %2711 = vmatprep.mubr.msk.bf16.mxu1 %vm3137_vm1, %v3136_v8 }
 0x183   :  { %2721 = vmatprep.subr.bf16.mxu1 %v3136_v8 }
 0x185   :  { %2706 = vmatmul.mubr.msk.bf16.vlgmr.msra.gmra.mrb[0].mxu0 %vm153_vm2, %v3273_v16 }
 0x186   :  { %2716 = vmatpush3.bf16.xpose.msra.mxu0 %v305_v24  ;;  %2717 = vmatprep.mubr.msk.bf16.mxu0 %vm3137_vm1, %v3136_v8 }
 0x187   :  { %2727 = vmatprep.subr.bf16.mxu0 %v3136_v8 }
 0x189   :  { %2712 = vmatmul.mubr.msk.bf16.vlgmr.msra.gmra.mrb[8].mxu1 %vm153_vm2, %v3265_v10 }
 0x18a   :  { %2723 = vmatprep.mubr.msk.bf16.mxu1 %vm3137_vm1, %v3136_v8 }
 0x18d   :  { %2718 = vmatmul.mubr.msk.bf16.vlgmr.msra.gmra.mrb[4].mxu0 %vm153_vm2, %v3271_v15 }
 0x18e   :  { %2729 = vmatprep.mubr.msk.bf16.mxu0 %vm3137_vm1, %v3136_v8 }
 0x254   :  { %v194_v25 = vpop.f32.mrb[4].mxu1 }
 0x255   :  { %v347_v26 = vmul.f32 0.35355338, %v194_v25  ;;  %v2701_v27 = vpop.f32.mrb[5].mxu1 }
 0x256   :  { %v197_v28 = vpop.f32.mrb[6].mxu1 }
 0x257   :  { %v2702_v29 = vpop.f32.mrb[7].mxu1  ;;  %v351_v30 = vsel %vm153_vm2, %v347_v26, -inf }
 0x258   :  { %352 = vmax.xlane.f32.xlu0 %v351_v30  ;;  %v243_v31 = vpop.f32.mrb[0].mxu0 }
 0x259   :  { %v348_v32 = vmul.f32 0.35355338, %v243_v31  ;;  %v2707_v33 = vpop.f32.mrb[1].mxu0 }
 0x25a   :  { %v246_v34 = vpop.f32.mrb[2].mxu0 }
 0x25b   :  { %v2708_v35 = vpop.f32.mrb[3].mxu0  ;;  %v354_v36 = vsel %vm153_vm2, %v348_v32, -inf }
 0x25c   :  { %v292_v37 = vpop.f32.mrb[8].mxu1  ;;  %355 = vmax.xlane.f32.xlu1 %v354_v36 }
 0x25d   :  { %v349_v38 = vmul.f32 0.35355338, %v292_v37  ;;  %v2713_v39 = vpop.f32.mrb[9].mxu1 }
 0x25e   :  { %v295_v40 = vpop.f32.mrb[10].mxu1 }
 0x25f   :  { %v2714_v41 = vpop.f32.mrb[11].mxu1  ;;  %v357_v42 = vsel %vm153_vm2, %v349_v38, -inf }
 0x260   :  { %358 = vmax.xlane.f32.xlu0 %v357_v42  ;;  %v341_v43 = vpop.f32.mrb[4].mxu0 }
 0x261   :  { %v350_v44 = vmul.f32 0.35355338, %v341_v43  ;;  %v2719_v45 = vpop.f32.mrb[5].mxu0 }
 0x262   :  { %v344_v46 = vpop.f32.mrb[6].mxu0 }
 0x263   :  { %v2720_v47 = vpop.f32.mrb[7].mxu0  ;;  %v360_v48 = vsel %vm153_vm2, %v350_v44, -inf }
 0x264   :  { %361 = vmax.xlane.f32.xlu0 %v360_v48 }
 0x26d   :  { %399 = vrot.lane.b32.xlu1 %v3267_v12, %s3133_s27 }
 0x2e5   :  { %v353_v49 = vpop.xlane.xlu0 %352 }
 0x2e6   :  { %v363_v50 = vsub.f32 %v347_v26, %v353_v49 }
 0x2e8   :  { %v367_v51 = vmul.f32 1.442695, %v363_v50 }
 0x2e9   :  { %v356_v52 = vpop.xlane.xlu1 %355 }
 0x2ea   :  { %2976 = vpow2.f32 %v367_v51  ;;  %v364_v53 = vsub.f32 %v348_v32, %v356_v52 }
 0x2ec   :  { %v369_v54 = vmul.f32 1.442695, %v364_v53 }
 0x2ed   :  { %v400_v55 = vpop.permute.xlu1 %399  ;;  %v359_v61 = vpop.xlane.xlu0 %358 }
 0x2ee   :  { %2978 = vpow2.f32 %v369_v54  ;;  %v406_v56 = vsel %vm404_vm3, %v400_v55, 0  ;;  %v365_v63 = vsub.f32 %v349_v38, %v359_v61 }
 0x2ef   :  { %2722 = vmatpush3.bf16.msra.mxu1 %v406_v56 }
 0x2f0   :  { %2733 = vmatprep.subr.bf16.mxu1 %v3136_v8  ;;  %v371_v1 = vmul.f32 1.442695, %v365_v63 }
 0x2f1   :  { %v362_v62 = vpop.xlane.xlu0 %361 }
 0x2f2   :  { %v366_v0 = vsub.f32 %v350_v44, %v362_v62  ;;  %2980 = vpow2.f32 %v371_v1 }
 0x2f4   :  { %v2977_v57 = vpop.eup %2976  ;;  %v373_v2 = vmul.f32 1.442695, %v366_v0 }
 0x2f5   :  { %v375_v58 = vsel %vm153_vm2, %v2977_v57, 0.0 }
 0x2f6   :  { %376 = vadd.xlane.f32.xlu1 %v375_v58  ;;  %2982 = vpow2.f32 %v373_v2 }
 0x2f8   :  { %v2979_v59 = vpop.eup %2978 }
 0x2f9   :  { %v378_v60 = vsel %vm153_vm2, %v2979_v59, 0.0 }
 0x2fa   :  { %379 = vadd.xlane.f32.xlu0 %v378_v60 }
 0x2fc   :  { %v2981_v3 = vpop.eup %2980 }
 0x2fd   :  { %v381_v5 = vsel %vm153_vm2, %v2981_v3, 0.0 }
 0x300   :  { %v2983_v4 = vpop.eup %2982 }
 0x301   :  { %v384_v6 = vsel %vm153_vm2, %v2983_v4, 0.0 }
 0x307   :  { %496 = vrot.lane.b32.xlu1 %v3265_v10, %s3133_s27 }
 0x30b   :  { %544 = vrot.lane.b32.xlu1 %v3271_v15, %s3133_s27 }
 0x310   :  { %448 = vrot.lane.b32.xlu0 %v3273_v16, %s3133_s27  ;;  %s3141_s27 = smov 56  }
 0x32f   :  { %382 = vadd.xlane.f32.xlu1 %v381_v5  ;;  %385 = vadd.xlane.f32.xlu0 %v384_v6 }
 0x340   :  { %647 = vrot.lane.b32.xlu1 %v3273_v16, %s3139_s16 }
 0x344   :  { %645 = vrot.lane.b32.xlu1 %v3273_v16, %s3140_s17 }
 0x345   :  { %597 = vrot.lane.b32.xlu0 %v3267_v12, %s3139_s16 }
 0x348   :  { %747 = vrot.lane.b32.xlu1 %v3271_v15, %s3139_s16 }
 0x349   :  { %595 = vrot.lane.b32.xlu0 %v3267_v12, %s3140_s17 }
 0x34c   :  { %745 = vrot.lane.b32.xlu1 %v3271_v15, %s3140_s17 }
 0x34d   :  { %697 = vrot.lane.b32.xlu0 %v3265_v10, %s3139_s16 }
 0x351   :  { %695 = vrot.lane.b32.xlu0 %v3265_v10, %s3140_s17 }
 0x383   :  { %v377_v7 = vpop.xlane.xlu1 %376 }
 0x384   :  { %2984 = vrcp.f32 %v377_v7 }
 0x387   :  { %v380_v9 = vpop.xlane.xlu0 %379  ;;  %v497_v17 = vpop.permute.xlu1 %496 }
 0x388   :  { %2986 = vrcp.f32 %v380_v9  ;;  %v502_v21 = vsel %vm404_vm3, %v497_v17, 0 }
 0x38b   :  { %v449_v11 = vpop.permute.xlu0 %448  ;;  %v545_v23 = vpop.permute.xlu1 %544 }
 0x38c   :  { %v454_v13 = vsel %vm404_vm3, %v449_v11, 0  ;;  %v550_v25 = vsel %vm404_vm3, %v545_v23, 0 }
 0x38d   :  { %2728 = vmatpush3.bf16.msra.mxu0 %v454_v13 }
 0x38e   :  { %v2985_v14 = vpop.eup %2984  ;;  %2739 = vmatprep.subr.bf16.mxu0 %v3136_v8 }
 0x38f   :  { %v391_v18 = vmul.f32 %v2985_v14, %v2977_v57 }
 0x391   :  { %v395_v19 = vpack.c.bf16 %v391_v18, %v391_v18 }
 0x392   :  { %v2987_v20 = vpop.eup %2986 }
 0x393   :  { %v392_v22 = vmul.f32 %v2987_v20, %v2979_v59  ;;  %2724 = vmatmul.mubr.msk.bf16.vlgmr.msra.gmra.mrb[12].mxu1 %vm153_vm2, %v395_v19 }
 0x394   :  { %2734 = vmatpush3.bf16.msra.mxu1 %v502_v21  ;;  %2735 = vmatprep.mubr.msk.bf16.mxu1 %vm3137_vm1, %v3136_v8 }
 0x395   :  { %v396_v24 = vpack.c.bf16 %v392_v22, %v392_v22  ;;  %2745 = vmatprep.subr.bf16.mxu1 %v3136_v8 }
 0x397   :  { %2730 = vmatmul.mubr.msk.bf16.vlgmr.msra.gmra.mrb[8].mxu0 %vm153_vm2, %v396_v24 }
 0x398   :  { %2740 = vmatpush3.bf16.msra.mxu0 %v550_v25  ;;  %2741 = vmatprep.mubr.msk.bf16.mxu0 %vm3137_vm1, %v3136_v8 }
 0x399   :  { %2751 = vmatprep.subr.bf16.mxu0 %v3136_v8 }
 0x3bc   :  { %v383_v26 = vpop.xlane.xlu1 %382  ;;  %v386_v27 = vpop.xlane.xlu0 %385 }
 0x3bd   :  { %2988 = vrcp.f32 %v383_v26 }
 0x3be   :  { %2990 = vrcp.f32 %v386_v27 }
 0x3c0   :  { %v598_v28 = vpop.permute.xlu0 %597  ;;  %v648_v29 = vpop.permute.xlu1 %647 }
 0x3c1   :  { %v603_v37 = vsel %vm153_vm2, %v598_v28, 0  ;;  %v653_v39 = vsel %vm153_vm2, %v648_v29, 0 }
 0x3c4   :  { %v596_v35 = vpop.permute.xlu0 %595  ;;  %v646_v38 = vpop.permute.xlu1 %645 }
 0x3c7   :  { %v2989_v30 = vpop.eup %2988 }
 0x3c8   :  { %v2991_v31 = vpop.eup %2990  ;;  %v393_v32 = vmul.f32 %v2989_v30, %v2981_v3  ;;  %v698_v40 = vpop.permute.xlu0 %697 }
 0x3c9   :  { %v394_v33 = vmul.f32 %v2991_v31, %v2983_v4  ;;  %v748_v41 = vpop.permute.xlu1 %747  ;;  %v703_v42 = vsel %vm153_vm2, %v698_v40, 0 }
 0x3ca   :  { %v397_v34 = vpack.c.bf16 %v393_v32, %v393_v32  ;;  %v753_v43 = vsel %vm153_vm2, %v748_v41, 0 }
 0x3cb   :  { %v398_v36 = vpack.c.bf16 %v394_v33, %v394_v33 }
 0x3cc   :  { %2736 = vmatmul.mubr.msk.bf16.vlgmr.msra.gmra.mrb[16].mxu1 %vm153_vm2, %v397_v34  ;;  %v696_v44 = vpop.permute.xlu0 %695 }
 0x3cd   :  { %2742 = vmatmul.mubr.msk.bf16.vlgmr.msra.gmra.mrb[12].mxu0 %vm153_vm2, %v398_v36  ;;  %2746 = vmatpush3.bf16.xpose.msra.mxu1 %v603_v37  ;;  %v746_v45 = vpop.permute.xlu1 %745 }
 0x3ce   :  { %2752 = vmatpush3.bf16.xpose.msra.mxu0 %v653_v39  ;;  %2747 = vmatprep.mubr.msk.bf16.mxu1 %vm3137_vm1, %v3136_v8 }
 0x3cf   :  { %2753 = vmatprep.mubr.msk.bf16.mxu0 %vm3137_vm1, %v3136_v8  ;;  %2757 = vmatprep.subr.bf16.mxu1 %v3136_v8 }
 0x3d0   :  { %2763 = vmatprep.subr.bf16.mxu0 %v3136_v8 }
 0x3d4   :  { %2748 = vmatmul.mubr.msk.bf16.vlgmr.msra.gmra.mrb[20].mxu1 %vm153_vm2, %v596_v35 }
 0x3d5   :  { %2754 = vmatmul.mubr.msk.bf16.vlgmr.msra.gmra.mrb[16].mxu0 %vm153_vm2, %v646_v38  ;;  %2758 = vmatpush3.bf16.xpose.msra.mxu1 %v703_v42 }
 0x3d6   :  { %2764 = vmatpush3.bf16.xpose.msra.mxu0 %v753_v43  ;;  %2759 = vmatprep.mubr.msk.bf16.mxu1 %vm3137_vm1, %v3136_v8 }
 0x3d7   :  { %2765 = vmatprep.mubr.msk.bf16.mxu0 %vm3137_vm1, %v3136_v8  ;;  %2769 = vmatprep.subr.bf16.mxu1 %v3136_v8 }
 0x3d8   :  { %2775 = vmatprep.subr.bf16.mxu0 %v3136_v8 }
 0x3dc   :  { %2760 = vmatmul.mubr.msk.bf16.vlgmr.msra.gmra.mrb[24].mxu1 %vm153_vm2, %v696_v44 }
 0x3dd   :  { %2766 = vmatmul.mubr.msk.bf16.vlgmr.msra.gmra.mrb[20].mxu0 %vm153_vm2, %v746_v45  ;;  %2771 = vmatprep.mubr.msk.bf16.mxu1 %vm3137_vm1, %v3136_v8 }
 0x3de   :  { %2777 = vmatprep.mubr.msk.bf16.mxu0 %vm3137_vm1, %v3136_v8 }
 0x466   :  { %v3365_v46 = vpop.f32.mrb[12].mxu1 }
 0x467   :  { %v2725_v47 = vpop.f32.mrb[13].mxu1 }
 0x468   :  { %v445_v48 = vpop.f32.mrb[14].mxu1 }
 0x469   :  { %v2726_v49 = vpop.f32.mrb[15].mxu1 }
 0x46a   :  { %v3367_v50 = vpop.f32.mrb[8].mxu0 }
 0x46b   :  { %v592_v51 = vpack.c.bf16 %v3367_v50, %v3365_v46  ;;  %v2731_v52 = vpop.f32.mrb[9].mxu0 }
 0x46c   :  { %v493_v53 = vpop.f32.mrb[10].mxu0 }
 0x46d   :  { %v2732_v54 = vpop.f32.mrb[11].mxu0 }
 0x49f   :  { %v3371_v55 = vpop.f32.mrb[16].mxu1 }
 0x4a0   :  { %v3373_v56 = vpop.f32.mrb[12].mxu0  ;;  %v2737_v57 = vpop.f32.mrb[17].mxu1 }
 0x4a1   :  { %v593_v58 = vpack.c.bf16 %v3373_v56, %v3371_v55  ;;  %v2743_v59 = vpop.f32.mrb[13].mxu0  ;;  %v541_v60 = vpop.f32.mrb[18].mxu1 }
 0x4a2   :  { %v589_v61 = vpop.f32.mrb[14].mxu0  ;;  %v2738_v62 = vpop.f32.mrb[19].mxu1 }
 0x4a3   :  { %v2744_v63 = vpop.f32.mrb[15].mxu0 }
 0x4a7   :  { %v639_v0 = vpop.f32.mrb[20].mxu1 }
 0x4a8   :  { %v795_v1 = vmul.f32 0.35355338, %v639_v0  ;;  %v689_v2 = vpop.f32.mrb[16].mxu0  ;;  %v2749_v3 = vpop.f32.mrb[21].mxu1 }
 0x4a9   :  { %v796_v4 = vmul.f32 0.35355338, %v689_v2  ;;  %v2755_v5 = vpop.f32.mrb[17].mxu0  ;;  %v642_v6 = vpop.f32.mrb[22].mxu1 }
 0x4aa   :  { %v692_v7 = vpop.f32.mrb[18].mxu0  ;;  %v2750_v9 = vpop.f32.mrb[23].mxu1  ;;  %v799_v11 = vsel %vm153_vm2, %v795_v1, -inf }
 0x4ab   :  { %v2756_v13 = vpop.f32.mrb[19].mxu0  ;;  %v802_v14 = vsel %vm153_vm2, %v796_v4, -inf  ;;  %800 = vmax.xlane.f32.xlu0 %v799_v11 }
 0x4ac   :  { %803 = vmax.xlane.f32.xlu1 %v802_v14 }
 0x4af   :  { %v739_v17 = vpop.f32.mrb[24].mxu1 }
 0x4b0   :  { %v797_v18 = vmul.f32 0.35355338, %v739_v17  ;;  %v789_v19 = vpop.f32.mrb[20].mxu0  ;;  %v2761_v20 = vpop.f32.mrb[25].mxu1 }
 0x4b1   :  { %v2767_v21 = vpop.f32.mrb[21].mxu0  ;;  %v742_v22 = vpop.f32.mrb[26].mxu1  ;;  %v798_v23 = vmul.f32 0.35355338, %v789_v19 }
 0x4b2   :  { %v792_v24 = vpop.f32.mrb[22].mxu0  ;;  %v2762_v25 = vpop.f32.mrb[27].mxu1  ;;  %v805_v26 = vsel %vm153_vm2, %v797_v18, -inf }
 0x4b3   :  { %v2768_v27 = vpop.f32.mrb[23].mxu0  ;;  %806 = vmax.xlane.f32.xlu0 %v805_v26  ;;  %v808_v28 = vsel %vm153_vm2, %v798_v23, -inf }
 0x4b7   :  { %809 = vmax.xlane.f32.xlu0 %v808_v28 }
 0x4bd   :  { %847 = vrot.lane.b32.xlu1 %v3267_v12, %s3141_s27 }
 0x538   :  { %v801_v29 = vpop.xlane.xlu0 %800 }
 0x539   :  { %v804_v30 = vpop.xlane.xlu1 %803  ;;  %v811_v31 = vsub.f32 %v795_v1, %v801_v29  ;;  %v1042_v29 = vld [vmem:[#allocation2 + $0x4] sm:$0xf] }
 0x53a   :  { %v812_v32 = vsub.f32 %v796_v4, %v804_v30  ;;  %v1050_v30 = vsel %vm404_vm3, %v1042_v29, 0 }
 0x53b   :  { %v815_v33 = vmul.f32 1.442695, %v811_v31  ;;  %v594_v31 = vld [vmem:[#allocation2] sm:$0xf] }
 0x53c   :  { %v817_v34 = vmul.f32 1.442695, %v812_v32 }
 0x53d   :  { %2992 = vpow2.f32 %v815_v33  ;;  %v848_v35 = vpop.permute.xlu1 %847 }
 0x53e   :  { %2994 = vpow2.f32 %v817_v34  ;;  %v853_v36 = vsel %vm404_vm3, %v848_v35, 0 }
 0x53f   :  { %2770 = vmatpush3.bf16.msra.mxu1 %v853_v36 }
 0x540   :  { %v807_v37 = vpop.xlane.xlu0 %806  ;;  %2781 = vmatprep.subr.bf16.mxu1 %v3136_v8 }
 0x541   :  { %v813_v38 = vsub.f32 %v797_v18, %v807_v37 }
 0x543   :  { %v819_v39 = vmul.f32 1.442695, %v813_v38 }
 0x544   :  { %v810_v40 = vpop.xlane.xlu0 %809 }
 0x545   :  { %2996 = vpow2.f32 %v819_v39  ;;  %v814_v41 = vsub.f32 %v798_v23, %v810_v40 }
 0x547   :  { %v2993_v42 = vpop.eup %2992  ;;  %v821_v43 = vmul.f32 1.442695, %v814_v41 }
 0x548   :  { %v2995_v44 = vpop.eup %2994  ;;  %v823_v45 = vsel %vm153_vm2, %v2993_v42, 0.0 }
 0x549   :  { %2998 = vpow2.f32 %v821_v43  ;;  %v826_v47 = vsel %vm153_vm2, %v2995_v44, 0.0  ;;  %824 = vadd.xlane.f32.xlu1 %v823_v45 }
 0x54a   :  { %827 = vadd.xlane.f32.xlu0 %v826_v47 }
 0x54f   :  { %v2997_v48 = vpop.eup %2996 }
 0x550   :  { %v829_v49 = vsel %vm153_vm2, %v2997_v48, 0.0 }
 0x551   :  { %830 = vadd.xlane.f32.xlu1 %v829_v49  ;;  %v1108_v49 = vsel %vm404_vm3, %v594_v31, 0 }
 0x553   :  { %v2999_v52 = vpop.eup %2998 }
 0x554   :  { %v832_v53 = vsel %vm153_vm2, %v2999_v52, 0.0 }
 0x555   :  { %833 = vadd.xlane.f32.xlu0 %v832_v53 }
 0x562   :  { %943 = vrot.lane.b32.xlu1 %v3265_v10, %s3141_s27 }
 0x566   :  { %991 = vrot.lane.b32.xlu1 %v3271_v15, %s3141_s27 }
 0x56a   :  { %1159 = vrot.lane.b32.xlu1 %v3267_v12, %s3142_s19 }
 0x56b   :  { %895 = vrot.lane.b32.xlu0 %v3273_v16, %s3141_s27 }
 0x56e   :  { %1209 = vrot.lane.b32.xlu1 %v3273_v16, %s3142_s19 }
 0x56f   :  { %1161 = vrot.lane.b32.xlu0 %v3267_v12, %s3143_s20 }
 0x572   :  { %1311 = vrot.lane.b32.xlu1 %v3271_v15, %s3143_s20 }
 0x573   :  { %1211 = vrot.lane.b32.xlu0 %v3273_v16, %s3143_s20 }
 0x576   :  { %1309 = vrot.lane.b32.xlu1 %v3271_v15, %s3142_s19 }
 0x577   :  { %1261 = vrot.lane.b32.xlu0 %v3265_v10, %s3143_s20 }
 0x57b   :  { %1259 = vrot.lane.b32.xlu0 %v3265_v10, %s3142_s19 }
 0x5d6   :  { %v825_v54 = vpop.xlane.xlu1 %824 }
 0x5d7   :  { %3000 = vrcp.f32 %v825_v54  ;;  %v828_v57 = vpop.xlane.xlu0 %827 }
 0x5d8   :  { %3002 = vrcp.f32 %v828_v57 }
 0x5de   :  { %v831_v59 = vpop.xlane.xlu1 %830 }
 0x5df   :  { %3004 = vrcp.f32 %v831_v59 }
 0x5e1   :  { %v3001_v60 = vpop.eup %3000 }
 0x5e2   :  { %v3003_v61 = vpop.eup %3002  ;;  %v839_v62 = vmul.f32 %v3001_v60, %v2993_v42  ;;  %v944_v63 = vpop.permute.xlu1 %943 }
 0x5e3   :  { %v834_v0 = vpop.xlane.xlu0 %833  ;;  %v840_v2 = vmul.f32 %v3003_v61, %v2995_v44  ;;  %v949_v3 = vsel %vm404_vm3, %v944_v63, 0 }
 0x5e4   :  { %3006 = vrcp.f32 %v834_v0  ;;  %v843_v1 = vpack.c.bf16 %v839_v62, %v839_v62 }
 0x5e5   :  { %v844_v9 = vpack.c.bf16 %v840_v2, %v840_v2 }
 0x5e6   :  { %2772 = vmatmul.mubr.msk.bf16.vlgmr.msra.gmra.mrb[28].mxu1 %vm153_vm2, %v843_v1  ;;  %v992_v6 = vpop.permute.xlu1 %991 }
 0x5e7   :  { %v896_v4 = vpop.permute.xlu0 %895  ;;  %2782 = vmatpush3.bf16.msra.mxu1 %v949_v3  ;;  %2783 = vmatprep.mubr.msk.bf16.mxu1 %vm3137_vm1, %v3136_v8  ;;  %v997_v13 = vsel %vm404_vm3, %v992_v6, 0 }
 0x5e8   :  { %v901_v5 = vsel %vm404_vm3, %v896_v4, 0  ;;  %2945 = vmatprep.subr.msk.bf16.mxu1 %vm404_vm3, %v1042_v29 }
 0x5e9   :  { %2776 = vmatpush3.bf16.msra.mxu0 %v901_v5  ;;  %v3005_v7 = vpop.eup %3004 }
 0x5ea   :  { %2787 = vmatprep.subr.bf16.mxu0 %v3136_v8  ;;  %v841_v11 = vmul.f32 %v3005_v7, %v2997_v48  ;;  %v1160_v22 = vpop.permute.xlu1 %1159 }
 0x5eb   :  { %v1162_v20 = vpop.permute.xlu0 %1161 }
 0x5ec   :  { %2778 = vmatmul.mubr.msk.bf16.vlgmr.msra.gmra.mrb[24].mxu0 %vm153_vm2, %v844_v9  ;;  %v845_v14 = vpack.c.bf16 %v841_v11, %v841_v11  ;;  %v1167_v21 = vsel %vm153_vm2, %v1162_v20, 0 }
 0x5ed   :  { %2788 = vmatpush3.bf16.msra.mxu0 %v997_v13  ;;  %2789 = vmatprep.mubr.msk.bf16.mxu0 %vm3137_vm1, %v3136_v8 }
 0x5ee   :  { %v3007_v17 = vpop.eup %3006  ;;  %2805 = vmatprep.subr.bf16.mxu0 %v3136_v8  ;;  %2784 = vmatmul.mubr.msk.bf16.vlgmr.msra.gmra.mrb[32].mxu1 %vm153_vm2, %v845_v14  ;;  %v1210_v24 = vpop.permute.xlu1 %1209 }
 0x5ef   :  { %v842_v18 = vmul.f32 %v3007_v17, %v2999_v52  ;;  %v1212_v23 = vpop.permute.xlu0 %1211  ;;  %2794 = vmatpush3.bf16.msra.mxu1 %v1050_v30 }
 0x5f0   :  { %v1217_v25 = vsel %vm153_vm2, %v1212_v23, 0  ;;  %2946 = vmatprep.subr.msk.bf16.mxu1 %vm404_vm3, %v594_v31 }
 0x5f1   :  { %v846_v19 = vpack.c.bf16 %v842_v18, %v842_v18 }
 0x5f2   :  { %v1312_v26 = vpop.permute.xlu1 %1311 }
 0x5f3   :  { %v1317_v27 = vsel %vm153_vm2, %v1312_v26, 0  ;;  %v1262_v61 = vpop.permute.xlu0 %1261 }
 0x5f4   :  { %2790 = vmatmul.mubr.msk.bf16.vlgmr.msra.gmra.mrb[28].mxu0 %vm153_vm2, %v846_v19  ;;  %v1267_v0 = vsel %vm153_vm2, %v1262_v61, 0 }
 0x5f5   :  { %2807 = vmatprep.mubr.msk.bf16.mxu0 %vm3137_vm1, %v3136_v8 }
 0x5f6   :  { %2806 = vmatpush3.bf16.xpose.msra.mxu0 %v1167_v21  ;;  %v1310_v28 = vpop.permute.xlu1 %1309 }
 0x5f7   :  { %2811 = vmatprep.subr.bf16.mxu0 %v3136_v8  ;;  %v1260_v4 = vpop.permute.xlu0 %1259 }
 0x5fd   :  { %2808 = vmatmul.mubr.msk.bf16.vlgmr.msra.gmra.mrb[32].mxu0 %vm153_vm2, %v1160_v22 }
 0x5fe   :  { %2812 = vmatpush3.bf16.xpose.msra.mxu0 %v1217_v25  ;;  %2813 = vmatprep.mubr.msk.bf16.mxu0 %vm3137_vm1, %v3136_v8 }
 0x5ff   :  { %2823 = vmatprep.subr.bf16.mxu0 %v3136_v8 }
 0x605   :  { %2814 = vmatmul.mubr.msk.bf16.vlgmr.msra.gmra.mrb[36].mxu0 %vm153_vm2, %v1210_v24 }
 0x606   :  { %2824 = vmatpush3.bf16.xpose.msra.mxu0 %v1317_v27  ;;  %2825 = vmatprep.mubr.msk.bf16.mxu0 %vm3137_vm1, %v3136_v8 }
 0x607   :  { %2835 = vmatprep.subr.bf16.mxu0 %v3136_v8 }
 0x60d   :  { %2826 = vmatmul.mubr.msk.bf16.vlgmr.msra.gmra.mrb[40].mxu0 %vm153_vm2, %v1310_v28 }
 0x60e   :  { %2837 = vmatprep.mubr.msk.bf16.mxu0 %vm3137_vm1, %v3136_v8 }
 0x6b9   :  { %v889_v32 = vpop.f32.mrb[28].mxu1 }
 0x6ba   :  { %v2773_v33 = vpop.f32.mrb[29].mxu1 }
 0x6bb   :  { %v892_v34 = vpop.f32.mrb[30].mxu1 }
 0x6bc   :  { %v2774_v35 = vpop.f32.mrb[31].mxu1 }
 0x6bf   :  { %v937_v36 = vpop.f32.mrb[24].mxu0 }
 0x6c0   :  { %v1039_v37 = vpack.c.bf16 %v937_v36, %v889_v32  ;;  %v2779_v38 = vpop.f32.mrb[25].mxu0 }
 0x6c1   :  { %v940_v39 = vpop.f32.mrb[26].mxu0  ;;  %v985_v41 = vpop.f32.mrb[32].mxu1 }
 0x6c2   :  { %v2780_v40 = vpop.f32.mrb[27].mxu0  ;;  %2795 = vmatprep.mubr.msk.bf16.mxu1 %vm153_vm2, %v1039_v37  ;;  %v2785_v42 = vpop.f32.mrb[33].mxu1 }
 0x6c3   :  { %v988_v43 = vpop.f32.mrb[34].mxu1 }
 0x6c4   :  { %v2786_v44 = vpop.f32.mrb[35].mxu1 }
 0x6c7   :  { %v1033_v45 = vpop.f32.mrb[28].mxu0 }
 0x6c8   :  { %v1040_v47 = vpack.c.bf16 %v1033_v45, %v985_v41  ;;  %v2791_v48 = vpop.f32.mrb[29].mxu0 }
 0x6c9   :  { %v1036_v52 = vpop.f32.mrb[30].mxu0 }
 0x6ca   :  { %v2792_v53 = vpop.f32.mrb[31].mxu0  ;;  %2796 = vmatmul.mubr.msk.bf16.vlgmr.msra.gmra.mrb[36].mxu1 %vm153_vm2, %v1040_v47 }
 0x6cb   :  { %2801 = vmatprep.mubr.msk.bf16.mxu1 %vm153_vm2, %v592_v51  ;;  %2800 = vmatpush3.bf16.msra.mxu1 %v1108_v49 }
 0x6cc   :  { %2817 = vmatprep.subr.bf16.mxu1 %v3136_v8 }
 0x6d0   :  { %v1203_v54 = vpop.f32.mrb[32].mxu0 }
 0x6d1   :  { %v1359_v57 = vmul.f32 0.35355338, %v1203_v54  ;;  %v2809_v59 = vpop.f32.mrb[33].mxu0 }
 0x6d2   :  { %v1206_v60 = vpop.f32.mrb[34].mxu0 }
 0x6d3   :  { %v2810_v62 = vpop.f32.mrb[35].mxu0  ;;  %v1363_v63 = vsel %vm153_vm2, %v1359_v57, -inf }
 0x6d4   :  { %1364 = vmax.xlane.f32.xlu0 %v1363_v63 }
 0x6d6   :  { %2802 = vmatmul.mubr.msk.bf16.vlgmr.msra.gmra.mrb[36].mxu1 %vm153_vm2, %v593_v58 }
 0x6d7   :  { %2818 = vmatpush3.bf16.xpose.msra.mxu1 %v1267_v0  ;;  %2819 = vmatprep.mubr.msk.bf16.mxu1 %vm3137_vm1, %v3136_v8 }
 0x6d8   :  { %v1253_v46 = vpop.f32.mrb[36].mxu0  ;;  %2829 = vmatprep.subr.bf16.mxu1 %v3136_v8 }
 0x6d9   :  { %v1360_v50 = vmul.f32 0.35355338, %v1253_v46  ;;  %v2815_v51 = vpop.f32.mrb[37].mxu0 }
 0x6da   :  { %v1256_v1 = vpop.f32.mrb[38].mxu0 }
 0x6db   :  { %v2816_v2 = vpop.f32.mrb[39].mxu0  ;;  %v1366_v3 = vsel %vm153_vm2, %v1360_v50, -inf }
 0x6dc   :  { %1367 = vmax.xlane.f32.xlu1 %v1366_v3 }
 0x6de   :  { %2820 = vmatmul.mubr.msk.bf16.vlgmr.msra.gmra.mrb[40].mxu1 %vm153_vm2, %v1260_v4 }
 0x6df   :  { %2831 = vmatprep.mubr.msk.bf16.mxu1 %vm3137_vm1, %v3136_v8 }
 0x6e0   :  { %v1353_v55 = vpop.f32.mrb[40].mxu0 }
 0x6e1   :  { %v2827_v56 = vpop.f32.mrb[41].mxu0  ;;  %v1362_v23 = vmul.f32 0.35355338, %v1353_v55 }
 0x6e2   :  { %v1356_v58 = vpop.f32.mrb[42].mxu0 }
 0x6e3   :  { %v2828_v5 = vpop.f32.mrb[43].mxu0  ;;  %v1372_v26 = vsel %vm153_vm2, %v1362_v23, -inf }
 0x761   :  { %v1365_v6 = vpop.xlane.xlu0 %1364 }
 0x762   :  { %v1375_v7 = vsub.f32 %v1359_v57, %v1365_v6 }
 0x764   :  { %v1379_v9 = vmul.f32 1.442695, %v1375_v7 }
 0x766   :  { %3008 = vpow2.f32 %v1379_v9 }
 0x769   :  { %v1368_v14 = vpop.xlane.xlu1 %1367 }
 0x76a   :  { %v1376_v17 = vsub.f32 %v1360_v50, %v1368_v14 }
 0x76c   :  { %v1381_v18 = vmul.f32 1.442695, %v1376_v17 }
 0x76e   :  { %3010 = vpow2.f32 %v1381_v18 }
 0x770   :  { %v3009_v11 = vpop.eup %3008 }
 0x771   :  { %v1387_v13 = vsel %vm153_vm2, %v3009_v11, 0.0 }
 0x772   :  { %1388 = vadd.xlane.f32.xlu1 %v1387_v13 }
 0x778   :  { %v3011_v27 = vpop.eup %3010 }
 0x779   :  { %v1390_v28 = vsel %vm153_vm2, %v3011_v27, 0.0 }
 0x783   :  { %1411 = vrot.lane.b32.xlu1 %v3267_v12, %s3144_s21 }
 0x787   :  { %1507 = vrot.lane.b32.xlu1 %v3265_v10, %s3144_s21 }
 0x7b1   :  { %v1303_v19 = vpop.f32.mrb[40].mxu1 }
 0x7b2   :  { %v1361_v20 = vmul.f32 0.35355338, %v1303_v19  ;;  %v2821_v21 = vpop.f32.mrb[41].mxu1 }
 0x7b3   :  { %v1306_v22 = vpop.f32.mrb[42].mxu1 }
 0x7b4   :  { %v2822_v24 = vpop.f32.mrb[43].mxu1  ;;  %v1369_v25 = vsel %vm153_vm2, %v1361_v20, -inf }
 0x7b5   :  { %1370 = vmax.xlane.f32.xlu0 %v1369_v25 }
 0x7b9   :  { %1373 = vmax.xlane.f32.xlu0 %v1372_v26 }
 0x7bd   :  { %1391 = vadd.xlane.f32.xlu0 %v1390_v28 }
 0x7ff   :  { %v1389_v29 = vpop.xlane.xlu1 %1388 }
 0x800   :  { %3012 = vrcp.f32 %v1389_v29 }
 0x803   :  { %v1412_v30 = vpop.permute.xlu1 %1411 }
 0x804   :  { %v1417_v31 = vsel %vm404_vm3, %v1412_v30, 0 }
 0x805   :  { %2830 = vmatpush3.bf16.msra.mxu1 %v1417_v31 }
 0x806   :  { %2841 = vmatprep.subr.bf16.mxu1 %v3136_v8 }
 0x807   :  { %v1508_v34 = vpop.permute.xlu1 %1507 }
 0x808   :  { %v1513_v36 = vsel %vm404_vm3, %v1508_v34, 0 }
 0x80a   :  { %v3013_v32 = vpop.eup %3012 }
 0x80b   :  { %v1403_v33 = vmul.f32 %v3013_v32, %v3009_v11  ;;  %v1606_v11 = vld [vmem:[#allocation2 + $0x8] sm:$0xf] }
 0x80c   :  { %v1614_v13 = vsel %vm404_vm3, %v1606_v11, 0 }
 0x80d   :  { %v1407_v35 = vpack.c.bf16 %v1403_v33, %v1403_v33 }
 0x80f   :  { %2832 = vmatmul.mubr.msk.bf16.vlgmr.msra.gmra.mrb[44].mxu1 %vm153_vm2, %v1407_v35 }
 0x810   :  { %2842 = vmatpush3.bf16.msra.mxu1 %v1513_v36  ;;  %2843 = vmatprep.mubr.msk.bf16.mxu1 %vm3137_vm1, %v3136_v8 }
 0x811   :  { %2947 = vmatprep.subr.msk.bf16.mxu1 %vm404_vm3, %v1606_v11 }
 0x842   :  { %v1371_v37 = vpop.xlane.xlu0 %1370 }
 0x843   :  { %v1377_v38 = vsub.f32 %v1361_v20, %v1371_v37 }
 0x845   :  { %v1383_v39 = vmul.f32 1.442695, %v1377_v38 }
 0x846   :  { %v1374_v40 = vpop.xlane.xlu0 %1373 }
 0x847   :  { %3014 = vpow2.f32 %v1383_v39  ;;  %v1378_v41 = vsub.f32 %v1362_v23, %v1374_v40 }
 0x849   :  { %v1385_v42 = vmul.f32 1.442695, %v1378_v41 }
 0x84a   :  { %v1392_v48 = vpop.xlane.xlu0 %1391 }
 0x84b   :  { %3016 = vpow2.f32 %v1385_v42 }
 0x84c   :  { %3018 = vrcp.f32 %v1392_v48 }
 0x851   :  { %v3015_v43 = vpop.eup %3014 }
 0x852   :  { %v1393_v44 = vsel %vm153_vm2, %v3015_v43, 0.0 }
 0x853   :  { %1394 = vadd.xlane.f32.xlu1 %v1393_v44 }
 0x855   :  { %v3017_v45 = vpop.eup %3016 }
 0x856   :  { %v1396_v47 = vsel %vm153_vm2, %v3017_v45, 0.0  ;;  %v3019_v57 = vpop.eup %3018 }
 0x857   :  { %1397 = vadd.xlane.f32.xlu0 %v1396_v47  ;;  %v1404_v61 = vmul.f32 %v3019_v57, %v3011_v27 }
 0x859   :  { %v1408_v51 = vpack.c.bf16 %v1404_v61, %v1404_v61 }
 0x864   :  { %1555 = vrot.lane.b32.xlu1 %v3271_v15, %s3144_s21 }
 0x868   :  { %1721 = vrot.lane.b32.xlu1 %v3273_v16, %s3145_s22 }
 0x86c   :  { %1719 = vrot.lane.b32.xlu1 %v3273_v16, %s3146_s2 }
 0x86d   :  { %1459 = vrot.lane.b32.xlu0 %v3273_v16, %s3144_s21 }
 0x870   :  { %1821 = vrot.lane.b32.xlu1 %v3271_v15, %s3145_s22 }
 0x871   :  { %1671 = vrot.lane.b32.xlu0 %v3267_v12, %s3145_s22 }
 0x874   :  { %1819 = vrot.lane.b32.xlu1 %v3271_v15, %s3146_s2 }
 0x875   :  { %1669 = vrot.lane.b32.xlu0 %v3267_v12, %s3146_s2 }
 0x879   :  { %1771 = vrot.lane.b32.xlu0 %v3265_v10, %s3145_s22 }
 0x87d   :  { %1769 = vrot.lane.b32.xlu0 %v3265_v10, %s3146_s2 }
 0x8e0   :  { %v1395_v49 = vpop.xlane.xlu1 %1394 }
 0x8e1   :  { %3020 = vrcp.f32 %v1395_v49 }
 0x8e2   :  { %v1453_v52 = vpop.f32.mrb[44].mxu1 }
 0x8e3   :  { %v2833_v53 = vpop.f32.mrb[45].mxu1 }
 0x8e4   :  { %v1456_v54 = vpop.f32.mrb[46].mxu1  ;;  %v1398_v59 = vpop.xlane.xlu0 %1397 }
 0x8e5   :  { %v2834_v60 = vpop.f32.mrb[47].mxu1  ;;  %3022 = vrcp.f32 %v1398_v59  ;;  %v1556_v46 = vpop.permute.xlu1 %1555 }
 0x8e6   :  { %v1561_v1 = vsel %vm404_vm3, %v1556_v46, 0 }
 0x8e8   :  { %v1460_v62 = vpop.permute.xlu0 %1459 }
 0x8e9   :  { %v1465_v63 = vsel %vm404_vm3, %v1460_v62, 0  ;;  %v1722_v23 = vpop.permute.xlu1 %1721 }
 0x8ea   :  { %2836 = vmatpush3.bf16.msra.mxu0 %v1465_v63  ;;  %v1727_v31 = vsel %vm153_vm2, %v1722_v23, 0 }
 0x8eb   :  { %v3021_v0 = vpop.eup %3020  ;;  %2847 = vmatprep.subr.bf16.mxu0 %v3136_v8 }
 0x8ec   :  { %v1405_v50 = vmul.f32 %v3021_v0, %v3015_v43  ;;  %v1672_v4 = vpop.permute.xlu0 %1671 }
 0x8ed   :  { %2838 = vmatmul.mubr.msk.bf16.vlgmr.msra.gmra.mrb[44].mxu0 %vm153_vm2, %v1408_v51  ;;  %v1677_v5 = vsel %vm153_vm2, %v1672_v4, 0  ;;  %v1720_v29 = vpop.permute.xlu1 %1719 }
 0x8ee   :  { %v1409_v2 = vpack.c.bf16 %v1405_v50, %v1405_v50  ;;  %2848 = vmatpush3.bf16.msra.mxu0 %v1561_v1  ;;  %2849 = vmatprep.mubr.msk.bf16.mxu0 %vm3137_vm1, %v3136_v8 }
 0x8ef   :  { %v3023_v3 = vpop.eup %3022  ;;  %2859 = vmatprep.subr.bf16.mxu0 %v3136_v8 }
 0x8f0   :  { %2844 = vmatmul.mubr.msk.bf16.vlgmr.msra.gmra.mrb[48].mxu1 %vm153_vm2, %v1409_v2  ;;  %v1406_v55 = vmul.f32 %v3023_v3, %v3017_v45  ;;  %v1670_v58 = vpop.permute.xlu0 %1669 }
 0x8f1   :  { %2854 = vmatpush3.bf16.msra.mxu1 %v1614_v13  ;;  %v1822_v33 = vpop.permute.xlu1 %1821 }
 0x8f2   :  { %v1410_v56 = vpack.c.bf16 %v1406_v55, %v1406_v55  ;;  %2865 = vmatprep.subr.bf16.mxu1 %v3136_v8  ;;  %v1827_v37 = vsel %vm153_vm2, %v1822_v33, 0 }
 0x8f4   :  { %v1772_v6 = vpop.permute.xlu0 %1771 }
 0x8f5   :  { %2850 = vmatmul.mubr.msk.bf16.vlgmr.msra.gmra.mrb[48].mxu0 %vm153_vm2, %v1410_v56  ;;  %v1777_v7 = vsel %vm153_vm2, %v1772_v6, 0  ;;  %v1820_v42 = vpop.permute.xlu1 %1819 }
 0x8f6   :  { %2861 = vmatprep.mubr.msk.bf16.mxu0 %vm3137_vm1, %v3136_v8 }
 0x8f7   :  { %2860 = vmatpush3.bf16.xpose.msra.mxu0 %v1677_v5 }
 0x8f8   :  { %2871 = vmatprep.subr.bf16.mxu0 %v3136_v8  ;;  %v1770_v9 = vpop.permute.xlu0 %1769 }
 0x8fe   :  { %2862 = vmatmul.mubr.msk.bf16.vlgmr.msra.gmra.mrb[52].mxu0 %vm153_vm2, %v1670_v58 }
 0x8ff   :  { %2872 = vmatpush3.bf16.xpose.msra.mxu0 %v1777_v7  ;;  %2873 = vmatprep.mubr.msk.bf16.mxu0 %vm3137_vm1, %v3136_v8 }
 0x900   :  { %2883 = vmatprep.subr.bf16.mxu0 %v3136_v8 }
 0x906   :  { %2874 = vmatmul.mubr.msk.bf16.vlgmr.msra.gmra.mrb[56].mxu0 %vm153_vm2, %v1770_v9 }
 0x907   :  { %2885 = vmatprep.mubr.msk.bf16.mxu0 %vm3137_vm1, %v3136_v8 }
 0x9c0   :  { %v1501_v14 = vpop.f32.mrb[44].mxu0 }
 0x9c1   :  { %v1603_v17 = vpack.c.bf16 %v1501_v14, %v1453_v52  ;;  %v2839_v18 = vpop.f32.mrb[45].mxu0 }
 0x9c2   :  { %v1504_v19 = vpop.f32.mrb[46].mxu0 }
 0x9c3   :  { %v1549_v20 = vpop.f32.mrb[48].mxu1  ;;  %v2840_v21 = vpop.f32.mrb[47].mxu0  ;;  %2855 = vmatprep.mubr.msk.bf16.mxu1 %vm153_vm2, %v1603_v17 }
 0x9c4   :  { %v2845_v22 = vpop.f32.mrb[49].mxu1 }
 0x9c5   :  { %v1552_v24 = vpop.f32.mrb[50].mxu1 }
 0x9c6   :  { %v2846_v25 = vpop.f32.mrb[51].mxu1 }
 0x9c8   :  { %v1597_v26 = vpop.f32.mrb[48].mxu0 }
 0x9c9   :  { %v1604_v27 = vpack.c.bf16 %v1597_v26, %v1549_v20  ;;  %v2851_v28 = vpop.f32.mrb[49].mxu0 }
 0x9ca   :  { %v1600_v30 = vpop.f32.mrb[50].mxu0 }
 0x9cb   :  { %v2852_v32 = vpop.f32.mrb[51].mxu0  ;;  %2856 = vmatmul.mubr.msk.bf16.vlgmr.msra.gmra.mrb[36].mxu1 %vm153_vm2, %v1604_v27 }
 0x9cc   :  { %2866 = vmatpush3.bf16.xpose.msra.mxu1 %v1727_v31  ;;  %2867 = vmatprep.mubr.msk.bf16.mxu1 %vm3137_vm1, %v3136_v8 }
 0x9cd   :  { %2877 = vmatprep.subr.bf16.mxu1 %v3136_v8 }
 0x9d1   :  { %v1713_v34 = vpop.f32.mrb[52].mxu0 }
 0x9d2   :  { %v1869_v35 = vmul.f32 0.35355338, %v1713_v34  ;;  %v2863_v36 = vpop.f32.mrb[53].mxu0 }
 0x9d3   :  { %v1716_v38 = vpop.f32.mrb[54].mxu0  ;;  %2868 = vmatmul.mubr.msk.bf16.vlgmr.msra.gmra.mrb[52].mxu1 %vm153_vm2, %v1720_v29 }
 0x9d4   :  { %2878 = vmatpush3.bf16.xpose.msra.mxu1 %v1827_v37  ;;  %v2864_v39 = vpop.f32.mrb[55].mxu0  ;;  %v1873_v40 = vsel %vm153_vm2, %v1869_v35, -inf  ;;  %2879 = vmatprep.mubr.msk.bf16.mxu1 %vm3137_vm1, %v3136_v8 }
 0x9d5   :  { %1874 = vmax.xlane.f32.xlu0 %v1873_v40  ;;  %2889 = vmatprep.subr.bf16.mxu1 %v3136_v8 }
 0x9d9   :  { %v1813_v41 = vpop.f32.mrb[56].mxu0 }
 0x9da   :  { %v1871_v43 = vmul.f32 0.35355338, %v1813_v41  ;;  %v2875_v44 = vpop.f32.mrb[57].mxu0 }
 0x9db   :  { %v1816_v45 = vpop.f32.mrb[58].mxu0  ;;  %2880 = vmatmul.mubr.msk.bf16.vlgmr.msra.gmra.mrb[56].mxu1 %vm153_vm2, %v1820_v42 }
 0x9dc   :  { %v2876_v47 = vpop.f32.mrb[59].mxu0  ;;  %v1879_v48 = vsel %vm153_vm2, %v1871_v43, -inf  ;;  %2891 = vmatprep.mubr.msk.bf16.mxu1 %vm3137_vm1, %v3136_v8 }
 0x9dd   :  { %1880 = vmax.xlane.f32.xlu0 %v1879_v48 }
 0xa62   :  { %v1875_v49 = vpop.xlane.xlu0 %1874 }
 0xa63   :  { %v1885_v52 = vsub.f32 %v1869_v35, %v1875_v49 }
 0xa65   :  { %v1889_v54 = vmul.f32 1.442695, %v1885_v52  ;;  %v2116_v52 = vld [vmem:[#allocation2 + $0xc] sm:$0xf] }
 0xa67   :  { %3024 = vpow2.f32 %v1889_v54 }
 0xa6a   :  { %v1881_v53 = vpop.xlane.xlu0 %1880 }
 0xa6b   :  { %v1887_v57 = vsub.f32 %v1871_v43, %v1881_v53  ;;  %v2124_v53 = vsel %vm404_vm3, %v2116_v52, 0 }
 0xa6d   :  { %v1893_v59 = vmul.f32 1.442695, %v1887_v57 }
 0xa6f   :  { %3026 = vpow2.f32 %v1893_v59 }
 0xa71   :  { %v3025_v50 = vpop.eup %3024 }
 0xa72   :  { %v1897_v51 = vsel %vm153_vm2, %v3025_v50, 0.0 }
 0xa79   :  { %v3027_v1 = vpop.eup %3026 }
 0xa7a   :  { %v1903_v5 = vsel %vm153_vm2, %v3027_v1, 0.0 }
 0xaa6   :  { %v1763_v60 = vpop.f32.mrb[52].mxu1 }
 0xaa7   :  { %v1870_v61 = vmul.f32 0.35355338, %v1763_v60  ;;  %v2869_v62 = vpop.f32.mrb[53].mxu1 }
 0xaa8   :  { %v1766_v63 = vpop.f32.mrb[54].mxu1 }
 0xaa9   :  { %v2870_v0 = vpop.f32.mrb[55].mxu1  ;;  %v1876_v46 = vsel %vm153_vm2, %v1870_v61, -inf }
 0xaaa   :  { %1877 = vmax.xlane.f32.xlu1 %v1876_v46 }
 0xaae   :  { %v1863_v2 = vpop.f32.mrb[56].mxu1  ;;  %1898 = vadd.xlane.f32.xlu1 %v1897_v51 }
 0xaaf   :  { %v1872_v3 = vmul.f32 0.35355338, %v1863_v2  ;;  %v2881_v4 = vpop.f32.mrb[57].mxu1 }
 0xab0   :  { %v1866_v55 = vpop.f32.mrb[58].mxu1 }
 0xab1   :  { %v2882_v56 = vpop.f32.mrb[59].mxu1  ;;  %v1882_v58 = vsel %vm153_vm2, %v1872_v3, -inf  ;;  %v3057_v55 = vld [vmem:[%s3633_s0 + $0x10] sm:$0xff] }
 0xab2   :  { %1883 = vmax.xlane.f32.xlu0 %v1882_v58  ;;  %1904 = vadd.xlane.f32.xlu1 %v1903_v5  ;;  %v3058_v58 = vld [vmem:[%s3633_s0 + $0x8] sm:$0xff] }
 0xac3   :  { %1921 = vrot.lane.b32.xlu1 %v3267_v12, %s3147_s18 }
 0xac7   :  { %2017 = vrot.lane.b32.xlu1 %v3265_v10, %s3147_s18 }
 0xacb   :  { %2065 = vrot.lane.b32.xlu1 %v3271_v15, %s3147_s18 }
 0xb37   :  { %v1878_v6 = vpop.xlane.xlu1 %1877 }
 0xb38   :  { %v1886_v7 = vsub.f32 %v1870_v61, %v1878_v6 }
 0xb3a   :  { %v1891_v9 = vmul.f32 1.442695, %v1886_v7 }
 0xb3b   :  { %v1899_v11 = vpop.xlane.xlu1 %1898 }
 0xb3c   :  { %3028 = vpow2.f32 %v1891_v9  ;;  %v3059_v9 = vld [vmem:[%s3633_s0 + $0x18] sm:$0xff] }
 0xb3d   :  { %3030 = vrcp.f32 %v1899_v11 }
 0xb3f   :  { %v1905_v13 = vpop.xlane.xlu1 %1904  ;;  %v1884_v14 = vpop.xlane.xlu0 %1883 }
 0xb40   :  { %v1888_v17 = vsub.f32 %v1872_v3, %v1884_v14  ;;  %3032 = vrcp.f32 %v1905_v13 }
 0xb42   :  { %v1895_v18 = vmul.f32 1.442695, %v1888_v17 }
 0xb43   :  { %v1922_v19 = vpop.permute.xlu1 %1921 }
 0xb44   :  { %3034 = vpow2.f32 %v1895_v18  ;;  %v1927_v12 = vsel %vm404_vm3, %v1922_v19, 0 }
 0xb45   :  { %2884 = vmatpush3.bf16.msra.mxu0 %v1927_v12 }
 0xb46   :  { %v3029_v10 = vpop.eup %3028  ;;  %2895 = vmatprep.subr.bf16.mxu0 %v3136_v8 }
 0xb47   :  { %v3031_v15 = vpop.eup %3030  ;;  %v1900_v20 = vsel %vm153_vm2, %v3029_v10, 0.0  ;;  %v2018_v22 = vpop.permute.xlu1 %2017 }
 0xb48   :  { %v1913_v21 = vmul.f32 %v3031_v15, %v3025_v50  ;;  %1901 = vadd.xlane.f32.xlu0 %v1900_v20  ;;  %v2023_v25 = vsel %vm404_vm3, %v2018_v22, 0 }
 0xb4a   :  { %v1917_v23 = vpack.c.bf16 %v1913_v21, %v1913_v21  ;;  %v3033_v24 = vpop.eup %3032 }
 0xb4b   :  { %v1915_v27 = vmul.f32 %v3033_v24, %v3027_v1  ;;  %v2066_v36 = vpop.permute.xlu1 %2065  ;;  %v3056_v1 = vld [vmem:[%s3633_s0] sm:$0xff] }
 0xb4c   :  { %2886 = vmatmul.mubr.msk.bf16.vlgmr.msra.gmra.mrb[60].mxu0 %vm153_vm2, %v1917_v23  ;;  %v2071_v38 = vsel %vm404_vm3, %v2066_v36, 0  ;;  %v2972_v36 = vld [vmem:[%s3640_s7] sm:$0xff]  }
 0xb4d   :  { %2896 = vmatpush3.bf16.msra.mxu0 %v2023_v25  ;;  %2897 = vmatprep.mubr.msk.bf16.mxu0 %vm3137_vm1, %v3136_v8  ;;  %v1919_v29 = vpack.c.bf16 %v1915_v27, %v1915_v27 }
 0xb4e   :  { %v3035_v26 = vpop.eup %3034 }
 0xb4f   :  { %v1906_v28 = vsel %vm153_vm2, %v3035_v26, 0.0 }
 0xb50   :  { %1907 = vadd.xlane.f32.xlu0 %v1906_v28 }
 0xb54   :  { %2898 = vmatmul.mubr.msk.bf16.vlgmr.msra.gmra.mrb[64].mxu0 %vm153_vm2, %v1919_v29 }
 0xb66   :  { %1969 = vrot.lane.b32.xlu0 %v3273_v16, %s3147_s18 }
 0xbd5   :  { %v1902_v30 = vpop.xlane.xlu0 %1901 }
 0xbd6   :  { %3036 = vrcp.f32 %v1902_v30 }
 0xbdd   :  { %v1908_v31 = vpop.xlane.xlu0 %1907 }
 0xbde   :  { %3038 = vrcp.f32 %v1908_v31 }
 0xbe0   :  { %v3037_v32 = vpop.eup %3036 }
 0xbe1   :  { %v1914_v33 = vmul.f32 %v3037_v32, %v3029_v10  ;;  %v1970_v34 = vpop.permute.xlu0 %1969 }
 0xbe2   :  { %v1975_v35 = vsel %vm404_vm3, %v1970_v34, 0  ;;  %v2970_v34 = vld [vmem:[#allocation5] sm:$0xff]  }
 0xbe3   :  { %2890 = vmatpush3.bf16.msra.mxu1 %v1975_v35  ;;  %v1918_v37 = vpack.c.bf16 %v1914_v33, %v1914_v33  ;;  %2913 = vmatprep.subr.bf16.mxu0 %v2970_v34  ;;  %v2971_v35 = vld [vmem:[#allocation5 + $0x8] sm:$0xff]  }
 0xbe4   :  { %2901 = vmatprep.subr.bf16.mxu1 %v3136_v8  ;;  %2914 = vmatpush3.bf16.msra.mxu0 %v2970_v34 }
 0xbe5   :  { %2915 = vmatprep.subr.bf16.mxu0 %v2971_v35 }
 0xbe6   :  { %2892 = vmatmul.mubr.msk.bf16.vlgmr.msra.gmra.mrb[60].mxu1 %vm153_vm2, %v1918_v37 }
 0xbe7   :  { %2902 = vmatpush3.bf16.msra.mxu1 %v2071_v38  ;;  %2903 = vmatprep.mubr.msk.bf16.mxu1 %vm3137_vm1, %v3136_v8 }
 0xbe8   :  { %v3039_v16 = vpop.eup %3038  ;;  %2948 = vmatprep.subr.msk.bf16.mxu1 %vm404_vm3, %v2116_v52  ;;  %2916 = vmatpush3.bf16.msra.mxu0 %v2971_v35  ;;  %v2583_v52 = vld [vmem:[%s3636_s3] ss:$0 sm:$0xff] }
 0xbe9   :  { %v1916_v39 = vmul.f32 %v3039_v16, %v3035_v26  ;;  %2921 = vmatprep.subr.bf16.mxu0 %v2972_v36 }
 0xbeb   :  { %v1920_v40 = vpack.c.bf16 %v1916_v39, %v1916_v39 }
 0xbee   :  { %2904 = vmatmul.mubr.msk.bf16.vlgmr.msra.gmra.mrb[64].mxu1 %vm153_vm2, %v1920_v40 }
 0xbef   :  { %2908 = vmatpush3.bf16.msra.mxu1 %v2124_v53 }
 0xc1f   :  { %v1963_v41 = vpop.f32.mrb[60].mxu0 }
 0xc20   :  { %v2887_v42 = vpop.f32.mrb[61].mxu0 }
 0xc21   :  { %v1966_v43 = vpop.f32.mrb[62].mxu0 }
 0xc22   :  { %v2888_v44 = vpop.f32.mrb[63].mxu0 }
 0xc27   :  { %v2059_v45 = vpop.f32.mrb[64].mxu0 }
 0xc28   :  { %v2899_v47 = vpop.f32.mrb[65].mxu0 }
 0xc29   :  { %v2062_v48 = vpop.f32.mrb[66].mxu0 }
 0xc2a   :  { %v2900_v49 = vpop.f32.mrb[67].mxu0 }
 0xcb9   :  { %v2011_v8 = vpop.f32.mrb[60].mxu1 }
 0xcba   :  { %v2113_v54 = vpack.c.bf16 %v2011_v8, %v1963_v41  ;;  %v2893_v57 = vpop.f32.mrb[61].mxu1 }
 0xcbb   :  { %v2014_v59 = vpop.f32.mrb[62].mxu1 }
 0xcbc   :  { %v2894_v60 = vpop.f32.mrb[63].mxu1  ;;  %2909 = vmatprep.mubr.msk.bf16.mxu1 %vm153_vm2, %v2113_v54 }
 0xcbd   :  { %v2584_v60 = vld [vmem:[%s3637_s4] ss:$0 sm:$0xff] }
 0xcc1   :  { %v2107_v61 = vpop.f32.mrb[64].mxu1 }
 0xcc2   :  { %v2114_v62 = vpack.c.bf16 %v2107_v61, %v2059_v45  ;;  %v2905_v63 = vpop.f32.mrb[65].mxu1 }
 0xcc3   :  { %v2110_v0 = vpop.f32.mrb[66].mxu1 }
 0xcc4   :  { %v2906_v46 = vpop.f32.mrb[67].mxu1  ;;  %2910 = vmatmul.mubr.msk.bf16.vlgmr.msra.gmra.mrb[36].mxu1 %vm153_vm2, %v2114_v62 }
 0xd97   :  { %v2911_v50 = vpop.f32.mrb[36].mxu1 }
 0xd98   :  { %v2160_v51 = vpop.f32.mrb[37].mxu1  ;;  %v2181_v56 = vadd.f32 %v3057_v55, %v2911_v50 }
 0xd99   :  { %v2179_v2 = vadd.f32 %v3056_v1, %v2160_v51  ;;  %v2912_v3 = vpop.f32.mrb[38].mxu1 }
 0xd9a   :  { %v2163_v4 = vpop.f32.mrb[39].mxu1  ;;  %v2182_v11 = vadd.f32 %v3059_v9, %v2912_v3  ;;  %v2191_v13 = vsel %vm90_vm0, %v2181_v56, 0.0 }
 0xd9b   :  { %v2180_v5 = vadd.f32 %v3058_v58, %v2163_v4  ;;  %v2185_v6 = vsel %vm90_vm0, %v2179_v2, 0.0  ;;  %v2974_v58 = vld [vmem:[%s3640_s7 + $0x10] sm:$0xff]  }
 0xd9c   :  { %2186 = vadd.xlane.f32.xlu0 %v2185_v6  ;;  %v2194_v14 = vsel %vm90_vm0, %v2182_v11, 0.0  ;;  %v2585_v6 = vld [vmem:[%s3639_s6] ss:$0 sm:$0xff] }
 0xd9d   :  { %v2188_v7 = vsel %vm90_vm0, %v2180_v5, 0.0 }
 0xd9e   :  { %2189 = vadd.xlane.f32.xlu1 %v2188_v7 }
 0xda0   :  { %2192 = vadd.xlane.f32.xlu0 %v2191_v13 }
 0xda4   :  { %2195 = vadd.xlane.f32.xlu0 %v2194_v14 }
 0xe29   :  { %v2187_v17 = vpop.xlane.xlu0 %2186 }
 0xe2a   :  { %v2198_v18 = vmul.f32 0.03125, %v2187_v17 }
 0xe2b   :  { %v2190_v19 = vpop.xlane.xlu1 %2189 }
 0xe2c   :  { %v2202_v12 = vsub.f32 %v2179_v2, %v2198_v18  ;;  %v2199_v10 = vmul.f32 0.03125, %v2190_v19 }
 0xe2d   :  { %v2193_v15 = vpop.xlane.xlu0 %2192 }
 0xe2e   :  { %v2203_v20 = vsub.f32 %v2180_v5, %v2199_v10  ;;  %v2200_v21 = vmul.f32 0.03125, %v2193_v15  ;;  %v2206_v22 = vmul.f32 %v2202_v12, %v2202_v12  ;;  %v2975_v5 = vld [vmem:[%s3640_s7 + $0x18] sm:$0xff]  }
 0xe30   :  { %v2204_v23 = vsub.f32 %v2181_v56, %v2200_v21  ;;  %v2210_v24 = vsel %vm90_vm0, %v2206_v22, 0.0  ;;  %v2207_v25 = vmul.f32 %v2203_v20, %v2203_v20  ;;  %v2973_v56 = vld [vmem:[%s3640_s7 + $0x8] sm:$0xff]  }
 0xe31   :  { %v2196_v26 = vpop.xlane.xlu0 %2195  ;;  %2211 = vadd.xlane.f32.xlu1 %v2210_v24 }
 0xe32   :  { %v2201_v27 = vmul.f32 0.03125, %v2196_v26  ;;  %v2213_v28 = vsel %vm90_vm0, %v2207_v25, 0.0  ;;  %v2208_v29 = vmul.f32 %v2204_v23, %v2204_v23 }
 0xe33   :  { %2214 = vadd.xlane.f32.xlu0 %v2213_v28 }
 0xe34   :  { %v2205_v30 = vsub.f32 %v2182_v11, %v2201_v27  ;;  %v2216_v31 = vsel %vm90_vm0, %v2208_v29, 0.0 }
 0xe35   :  { %2217 = vadd.xlane.f32.xlu1 %v2216_v31 }
 0xe36   :  { %v2209_v32 = vmul.f32 %v2205_v30, %v2205_v30 }
 0xe38   :  { %v2219_v33 = vsel %vm90_vm0, %v2209_v32, 0.0 }
 0xe39   :  { %2220 = vadd.xlane.f32.xlu0 %v2219_v33 }
 0xebe   :  { %v2212_v37 = vpop.xlane.xlu1 %2211 }
 0xebf   :  { %v2222_v38 = vmul.f32 0.03125, %v2212_v37 }
 0xec0   :  { %v2215_v16 = vpop.xlane.xlu0 %2214 }
 0xec1   :  { %v2226_v39 = vadd.f32 1e-06, %v2222_v38  ;;  %v2223_v40 = vmul.f32 0.03125, %v2215_v16 }
 0xec2   :  { %v2218_v41 = vpop.xlane.xlu1 %2217 }
 0xec3   :  { %3040 = vrsqrt.f32 %v2226_v39  ;;  %v2227_v42 = vadd.f32 1e-06, %v2223_v40  ;;  %v2224_v43 = vmul.f32 0.03125, %v2218_v41 }
 0xec5   :  { %3042 = vrsqrt.f32 %v2227_v42  ;;  %v2228_v44 = vadd.f32 1e-06, %v2224_v43 }
 0xec6   :  { %v2221_v45 = vpop.xlane.xlu0 %2220 }
 0xec7   :  { %3044 = vrsqrt.f32 %v2228_v44  ;;  %v2225_v47 = vmul.f32 0.03125, %v2221_v45 }
 0xec9   :  { %v2229_v48 = vadd.f32 1e-06, %v2225_v47 }
 0xecb   :  { %3046 = vrsqrt.f32 %v2229_v48 }
 0xecd   :  { %v3041_v49 = vpop.eup %3040 }
 0xece   :  { %v2234_v53 = vmul.f32 %v3041_v49, %v2202_v12 }
 0xecf   :  { %v3043_v8 = vpop.eup %3042 }
 0xed0   :  { %v2235_v54 = vmul.f32 %v3043_v8, %v2203_v20  ;;  %v2244_v57 = vmul.f32 %v2583_v52, %v2234_v53 }
 0xed1   :  { %v3045_v59 = vpop.eup %3044 }
 0xed2   :  { %v2236_v61 = vmul.f32 %v3045_v59, %v2204_v23  ;;  %v2245_v62 = vmul.f32 %v2583_v52, %v2235_v54  ;;  %v2254_v63 = vadd.f32 %v2584_v60, %v2244_v57  ;;  %v2590_v23 = vld [vmem:[%s3641_s8] ss:$0 sm:$0xff] }
 0xed4   :  { %v2255_v0 = vadd.f32 %v2584_v60, %v2245_v62  ;;  %v2246_v50 = vmul.f32 %v2583_v52, %v2236_v61 }
 0xed5   :  { %v3047_v46 = vpop.eup %3046 }
 0xed6   :  { %v2237_v51 = vmul.f32 %v3047_v46, %v2205_v30  ;;  %v2258_v1 = vpack.c.bf16 %v2255_v0, %v2254_v63  ;;  %v2256_v3 = vadd.f32 %v2584_v60, %v2246_v50 }
 0xed8   :  { %v2247_v2 = vmul.f32 %v2583_v52, %v2237_v51  ;;  %2917 = vmatprep.mubr.msk.bf16.mxu0 %vm90_vm0, %v2258_v1 }
 0xeda   :  { %v2257_v4 = vadd.f32 %v2584_v60, %v2247_v2 }
 0xedc   :  { %v2259_v55 = vpack.c.bf16 %v2257_v4, %v2256_v3 }
 0xede   :  { %2918 = vmatmul.mubr.msk.bf16.vlgmr.msra.gmra.mrb[68].mxu0 %vm90_vm0, %v2259_v55 }
 0xedf   :  { %2922 = vmatpush3.bf16.msra.mxu0 %v2972_v36 }
 0xee0   :  { %2923 = vmatprep.subr.bf16.mxu0 %v2973_v56 }
 0xee3   :  { %2924 = vmatpush3.bf16.msra.mxu0 %v2973_v56 }
 0xee4   :  { %2925 = vmatprep.subr.bf16.mxu0 %v2974_v58 }
 0xee7   :  { %2926 = vmatpush3.bf16.msra.mxu0 %v2974_v58 }
 0xee8   :  { %2927 = vmatprep.subr.bf16.mxu0 %v2975_v5 }
 0xeeb   :  { %2928 = vmatpush3.bf16.msra.mxu0 %v2975_v5 }
 0xfb1   :  { %v2919_v7 = vpop.f32.mrb[68].mxu0 }
 0xfb2   :  { %v2332_v9 = vadd.f32 %v2919_v7, %v2585_v6  ;;  %v2323_v11 = vpop.f32.mrb[69].mxu0  ;;  %v2597_v7 = vld [vmem:[%s3642_s9] ss:$0 sm:$0xff]  ;;  %s2526_s9 = sshll.u32 %s3148_s23, 4  ;;  %s2527_s9 = int_to_ptr.vmem [resolvable:$true] %s2526_s9 }
 0xfb3   :  { %v2324_v13 = vadd.f32 %v2585_v6, %v2323_v11  ;;  %v2920_v14 = vpop.f32.mrb[70].mxu0  ;;  %p3109_p3 = scmp.lt.s32.totalorder %s2527_s9, %s2527_s9 }
 0xfb4   :  { %v2335_v17 = vadd.f32 %v2920_v14, %v2585_v6  ;;  %v2326_v18 = vpop.f32.mrb[71].mxu0  ;;  %v2340_v12 = vmax.f32 %v2332_v9, 0.0 }
 0xfb5   :  { %v2327_v19 = vadd.f32 %v2585_v6, %v2326_v18  ;;  %v2338_v15 = vmax.f32 %v2324_v13, 0.0  ;;  %v2598_v13 = vld [vmem:[%s3643_s10] ss:$0 sm:$0xff]  ;;  %s3104_s10 = scalar_lea.vmem %s2527_s9, 512 }
 0xfb6   :  { %v2341_v10 = vmax.f32 %v2335_v17, 0.0  ;;  %p3105_p2 = scmp.ne.s32.totalorder %s2527_s9, %s3104_s10  ;;  %p3110_p4 = scmp.lt.s32.totalorder %s3104_s10, %s3104_s10 }
 0xfb7   :  { %v2339_v20 = vmax.f32 %v2327_v19, 0.0 }
 0xfb8   :  { %v2343_v21 = vpack.c.bf16 %v2341_v10, %v2340_v12  ;;  %p3111_p5 = por %p3110_p4, %p3109_p3 }
 0xfb9   :  { %v2342_v22 = vpack.c.bf16 %v2339_v20, %v2338_v15 }
 0xfba   :  { %p3112_p6 = pnand %p3111_p5, %p3105_p2 }
 0xfbb   :  { %2929 = vmatprep.mubr.msk.bf16.mxu0 %vm2383_vm4, %v2342_v22 }
 0xfbc   :  { %2930 = vmatmul.mubr.msk.bf16.vlgmr.msra.gmra.mrb[72].mxu0 %vm2383_vm4, %v2343_v21 }
0x108f   :  { %v2931_v24 = vpop.f32.mrb[72].mxu0 }
0x1090   :  { %v2424_v25 = vpop.f32.mrb[73].mxu0  ;;  %v2433_v26 = vadd.f32 %v2931_v24, %v2590_v23 }
0x1091   :  { %v2425_v27 = vadd.f32 %v2590_v23, %v2424_v25  ;;  %v2932_v28 = vpop.f32.mrb[74].mxu0 }
0x1092   :  { %v2427_v29 = vpop.f32.mrb[75].mxu0  ;;  %v2436_v30 = vadd.f32 %v2932_v28, %v2590_v23  ;;  %v2441_v35 = vadd.f32 %v2433_v26, %v2256_v3 }
0x1093   :  { %v2428_v31 = vadd.f32 %v2590_v23, %v2427_v29  ;;  %v2439_v32 = vadd.f32 %v2425_v27, %v2254_v63 }
0x1094   :  { %v2442_v37 = vadd.f32 %v2436_v30, %v2257_v4  ;;  %v2451_v38 = vsel %vm90_vm0, %v2441_v35, 0.0 }
0x1095   :  { %v2445_v33 = vsel %vm90_vm0, %v2439_v32, 0.0  ;;  %v2440_v34 = vadd.f32 %v2428_v31, %v2255_v0 }
0x1096   :  { %2446 = vadd.xlane.f32.xlu1 %v2445_v33  ;;  %v2454_v16 = vsel %vm90_vm0, %v2442_v37, 0.0 }
0x1097   :  { %v2448_v36 = vsel %vm90_vm0, %v2440_v34, 0.0 }
0x1098   :  { %2449 = vadd.xlane.f32.xlu0 %v2448_v36 }
0x109a   :  { %2452 = vadd.xlane.f32.xlu1 %v2451_v38 }
0x109c   :  { %2455 = vadd.xlane.f32.xlu0 %v2454_v16 }
0x1123   :  { %v2447_v39 = vpop.xlane.xlu1 %2446 }
0x1124   :  { %v2457_v40 = vmul.f32 0.03125, %v2447_v39 }
0x1125   :  { %v2450_v41 = vpop.xlane.xlu0 %2449 }
0x1126   :  { %v2461_v42 = vsub.f32 %v2439_v32, %v2457_v40  ;;  %v2458_v43 = vmul.f32 0.03125, %v2450_v41 }
0x1127   :  { %v2453_v44 = vpop.xlane.xlu1 %2452 }
0x1128   :  { %v2462_v45 = vsub.f32 %v2440_v34, %v2458_v43  ;;  %v2459_v47 = vmul.f32 0.03125, %v2453_v44  ;;  %v2465_v48 = vmul.f32 %v2461_v42, %v2461_v42 }
0x1129   :  { %v2456_v49 = vpop.xlane.xlu0 %2455 }
0x112a   :  { %v2463_v52 = vsub.f32 %v2441_v35, %v2459_v47  ;;  %v2460_v53 = vmul.f32 0.03125, %v2456_v49  ;;  %v2469_v8 = vsel %vm90_vm0, %v2465_v48, 0.0  ;;  %v2466_v54 = vmul.f32 %v2462_v45, %v2462_v45 }
0x112b   :  { %2470 = vadd.xlane.f32.xlu1 %v2469_v8 }
0x112c   :  { %v2464_v57 = vsub.f32 %v2442_v37, %v2460_v53  ;;  %v2472_v59 = vsel %vm90_vm0, %v2466_v54, 0.0  ;;  %v2467_v60 = vmul.f32 %v2463_v52, %v2463_v52 }
0x112d   :  { %2473 = vadd.xlane.f32.xlu0 %v2472_v59 }
0x112e   :  { %v2475_v61 = vsel %vm90_vm0, %v2467_v60, 0.0  ;;  %v2468_v62 = vmul.f32 %v2464_v57, %v2464_v57 }
0x112f   :  { %2476 = vadd.xlane.f32.xlu1 %v2475_v61 }
0x1130   :  { %v2478_v63 = vsel %vm90_vm0, %v2468_v62, 0.0 }
0x1131   :  { %2479 = vadd.xlane.f32.xlu0 %v2478_v63 }
0x11b8   :  { %v2471_v0 = vpop.xlane.xlu1 %2470 }
0x11b9   :  { %v2481_v46 = vmul.f32 0.03125, %v2471_v0 }
0x11ba   :  { %v2474_v50 = vpop.xlane.xlu0 %2473 }
0x11bb   :  { %v2485_v51 = vadd.f32 1e-06, %v2481_v46  ;;  %v2482_v1 = vmul.f32 0.03125, %v2474_v50 }
0x11bc   :  { %v2477_v2 = vpop.xlane.xlu1 %2476 }
0x11bd   :  { %3048 = vrsqrt.f32 %v2485_v51  ;;  %v2486_v3 = vadd.f32 1e-06, %v2482_v1  ;;  %v2483_v4 = vmul.f32 0.03125, %v2477_v2 }
0x11be   :  { %v2480_v55 = vpop.xlane.xlu0 %2479 }
0x11bf   :  { %3050 = vrsqrt.f32 %v2486_v3  ;;  %v2487_v56 = vadd.f32 1e-06, %v2483_v4  ;;  %v2484_v58 = vmul.f32 0.03125, %v2480_v55 }
0x11c1   :  { %3052 = vrsqrt.f32 %v2487_v56  ;;  %v2488_v5 = vadd.f32 1e-06, %v2484_v58 }
0x11c3   :  { %3054 = vrsqrt.f32 %v2488_v5 }
0x11c7   :  { %v3049_v6 = vpop.eup %3048 }
0x11c8   :  { %v2493_v9 = vmul.f32 %v3049_v6, %v2461_v42 }
0x11c9   :  { %v3051_v11 = vpop.eup %3050 }
0x11ca   :  { %v2503_v14 = vmul.f32 %v2597_v7, %v2493_v9  ;;  %v2494_v17 = vmul.f32 %v3051_v11, %v2462_v45 }
0x11cb   :  { %v3053_v18 = vpop.eup %3052 }
0x11cc   :  { %v2513_v19 = vadd.f32 %v2598_v13, %v2503_v14  ;;  %v2504_v12 = vmul.f32 %v2597_v7, %v2494_v17  ;;  %v2495_v10 = vmul.f32 %v3053_v18, %v2463_v52 }
0x11cd   :  { %v3055_v15 = vpop.eup %3054 }
0x11ce   :  { %2517 = vst.msk [vmem:[#allocation7] sm:$0xff] %vm90_vm0, %v2513_v19  ;;  %v2514_v20 = vadd.f32 %v2598_v13, %v2504_v12  ;;  %v2505_v21 = vmul.f32 %v2597_v7, %v2495_v10  ;;  %v2496_v22 = vmul.f32 %v3055_v15, %v2464_v57 }
0x11d0   :  { %2518 = vst.msk [vmem:[#allocation7 + $0x8] sm:$0xff] %vm90_vm0, %v2514_v20  ;;  %v2515_v23 = vadd.f32 %v2598_v13, %v2505_v21  ;;  %v2506_v24 = vmul.f32 %v2597_v7, %v2496_v22 }
0x11d2   :  { %2519 = vst.msk [vmem:[#allocation7 + $0x10] sm:$0xff] %vm90_vm0, %v2515_v23  ;;  %v2516_v25 = vadd.f32 %v2598_v13, %v2506_v24 }
0x11d4   :  { %2520 = vst.msk [vmem:[#allocation7 + $0x18] sm:$0xff] %vm90_vm0, %v2516_v25 }
0x11d5   :  { %3115 = shalt.err (!%p3112_p6)
}
0x11d6   :  { %s3116_s26 = scalar_lea.hbm %s3644_s11, 512 }
0x11d7   :  { %p3117_p7 = scmp.ne.s32.totalorder %s3644_s11, %s3116_s26  ;;  %p3120_p8 = scmp.lt.u32.totalorder %s3116_s26, %s3644_s11 }
0x11d9   :  { %p3122_p9 = pnand %p3120_p8, %p3117_p7 }
0x11db   :  { %3125 = shalt.err (!%p3122_p9)
}
0x11dc   :  { %s3149_s0 = smov 128   ;;  %s3150_s5 = smov 8  }
0x11dd   :  { %2532 = dma.vmem_to_hbm [thread:$0]  %s2527_s9, 512, %s3644_s11, [#allocation4], %s3149_s0, %s3149_s0, %s3150_s5  }
0x11de   :  { %3130 = dma.done.wait [#allocation4], 512  }
0x11df   :  { %3131 = vsyncadd [#allocation4], 4294966784 }
0x11e0   :  { %2536 = vsyncpa [#allocation3], 1 }
0x11e1   :  { %2537 = vsyncpa [#allocation6], 1 }
0x11e2   :  { %2538 = vsyncpa [#allocation4], 1 }

</bundles_post_ra>
